<compile_context>
chip_gen: v5e
topology: v5e:2x2
jax: 0.10.0
libtpu: 0.0.40
codegen_flags: <defaults>
</compile_context>

<pallas_src>
import numpy as np
import jax
import jax.numpy as jnp
from jax import lax
from jax.experimental import pallas as pl
from jax.experimental.pallas import tpu as pltpu

# ---------------- config (small synthetic shapes) ----------------
VOCAB = 50          # pretrain_word_embedding.shape[0]
WORD_DIM = 16       # pretrain_word_embedding.shape[1]
WORD_PAD = 0
NUM_CHARS = 30
CHAR_DIM = 8
CHAR_PAD = 0
MAX_CHAR_LEN = 4
KSIZE = 3           # cnn_kernel_size
HIDDEN = 32         # hidden_dim
NUM_TAGS = 8
START_ID = 6
END_ID = 7
BSZ = 2
SEQ_LEN = 8
NEG = -1000000000000.0          # -1e12, same constant as the PyTorch code
TT = NUM_TAGS * NUM_TAGS        # 64 real CRF columns
TT_PAD = 128                    # lane-dense padded CRF output width


# ---------------- fused Pallas kernel ----------------

def ner_fused_kernel(word_ref, im2col_ref, convw_ref, convb_ref,
                     wihf_ref, wihb_ref, whh_ref, bias_ref,
                     crfw_ref, crfb_ref, keep_ref, static_ref,
                     perm_ref, valid_ref, negpad_ref, out_ref):
    """Whole NERModel forward (eval mode) in one grid-less invocation.

    word:    (B, S, WORD_DIM) f32      word embeddings
    im2col:  (Lout, B*S, K*CD) bf16    per-output-position conv patches
    convw:   (K*CD, CD) bf16, convb: (1, CD) f32
    wihf/b:  (Din, 8H) bf16  direction-masked, gate cols [i_f,i_b,f_f,f_b,...]
    whh:     (2H, 8H) bf16   block-diagonal per direction, same col layout
    bias:    (1, 8H) f32     (bias_ih + bias_hh), both directions interleaved
    crfw:    (2H, 128) bf16, crfb: (1, 128) f32     (cols >= 64 are zero pad)
    keep:    (1, S, 128) f32   1.0 where the data path applies, else 0.0
    static:  (1, S, 128) f32   baked static CRF mask value (NEG / 0)
    perm:    (B, S, S) f32     per-sample valid-segment reversal matrix
    valid:   (B, S, 1) f32     1.0 for t < len, else 0.0
    negpad:  (B, S, 1) f32     0.0 for t < len, else NEG
    out:     (B, S, 128) f32   lane-dense transition scores
    """
    B, S, _ = word_ref.shape
    Lout = im2col_ref.shape[0]
    CD = convw_ref.shape[1]
    H = HIDDEN
    H2 = 2 * H
    TTP = crfw_ref.shape[1]

    # ---- CharCNN: Lout small bf16 matmuls + running max (im2col from wrapper) ----
    convw = convw_ref[...]
    pooled = jnp.dot(im2col_ref[0], convw, preferred_element_type=jnp.float32)
    for l in range(1, Lout):
        pooled = jnp.maximum(
            pooled, jnp.dot(im2col_ref[l], convw, preferred_element_type=jnp.float32))
    char_emb = (pooled + convb_ref[0]).reshape(B, S, CD)              # (B, S, CD)

    # ---- concat word/char; pack_padded reversal applied in INPUT space ----
    x = jnp.concatenate([word_ref[...], char_emb], axis=-1)           # (B, S, Din) f32
    perm = perm_ref[...]
    x_rev = jnp.einsum('bts,bsd->btd', perm, x,
                       preferred_element_type=jnp.float32)            # (B, S, Din)
    din = x.shape[-1]
    xf = x.reshape(B * S, din).astype(jnp.bfloat16)
    xr = x_rev.reshape(B * S, din).astype(jnp.bfloat16)
    g_pre = (jnp.dot(xf, wihf_ref[...], preferred_element_type=jnp.float32)
             + jnp.dot(xr, wihb_ref[...], preferred_element_type=jnp.float32)
             + bias_ref[0]).reshape(B, S, 8 * H)                      # (B, S, 8H)

    # ---- fused bidirectional LSTM recurrence (unrolled, states in vregs) ----
    whh = whh_ref[...]                                                # (2H, 8H) bf16
    h = jnp.zeros((B, H2), jnp.float32)                               # [h_fwd | h_bwd]
    c = jnp.zeros((B, H2), jnp.float32)
    hs = []
    for s in range(S):
        gates = g_pre[:, s, :] + jnp.dot(h.astype(jnp.bfloat16), whh,
                                         preferred_element_type=jnp.float32)
        i_g = jax.nn.sigmoid(gates[:, 0:H2])
        f_g = jax.nn.sigmoid(gates[:, H2:2 * H2])
        g_g = jnp.tanh(gates[:, 2 * H2:3 * H2])
        o_g = jax.nn.sigmoid(gates[:, 3 * H2:4 * H2])
        c = f_g * c + i_g * g_g
        h = o_g * jnp.tanh(c)
        hs.append(h)
    h_all = jnp.concatenate([hh.reshape(B, 1, H2) for hh in hs], axis=1)  # (B, S, 2H)

    # ---- pad_packed zeroing + backward output re-reversal ----
    valid = valid_ref[...]                                            # (B, S, 1)
    h_fwd = h_all[:, :, 0:H] * valid
    h_bwd = jnp.einsum('bts,bsh->bth', perm, h_all[:, :, H:H2],
                       preferred_element_type=jnp.float32)
    hidden = jnp.concatenate([h_fwd, h_bwd], axis=-1)                 # (B, S, 2H)

    # ---- CRF linear (lane-dense, 128 output cols) + masks ----
    raw = (jnp.dot(hidden.reshape(B * S, H2).astype(jnp.bfloat16), crfw_ref[...],
                   preferred_element_type=jnp.float32)
           + crfb_ref[0]).reshape(B, S, TTP)
    # length mask (data dependent), then baked static masks — matches the
    # PyTorch ordering (length NEG first, (END,END)=0 / START masks after).
    out = (raw * valid + negpad_ref[...]) * keep_ref[...] + static_ref[...]
    out_ref[...] = out


# ---------------- wrappers ----------------

@jax.jit
def _ner_forward_jit(params, sequences, lens_arr, chars):
    B, S = sequences.shape
    L = chars.shape[2]
    K = KSIZE
    CD = CHAR_DIM
    N = B * S
    Lout = L + K - 1                      # Conv1d(padding=K-1) output length

    # embedding gathers + im2col layout plumbing stay in XLA (fused, cheap)
    word_emb = params["word_embed"][sequences]                        # (B, S, WORD_DIM)
    char_pad = jnp.pad(params["char_embed"][chars].reshape(N, L, CD),
                       ((0, 0), (K - 1, K - 1), (0, 0)))              # (N, L+2(K-1), CD)
    im2col = jnp.stack(
        [char_pad[:, l:l + K, :].reshape(N, K * CD) for l in range(Lout)],
        axis=0).astype(jnp.bfloat16)                                  # (Lout, N, K*CD)

    # length-dependent plumbing: reversal perm + validity masks
    lens3 = lens_arr.reshape(B, 1, 1).astype(jnp.int32)
    t_i = lax.broadcasted_iota(jnp.int32, (B, S, S), 1)
    s_i = lax.broadcasted_iota(jnp.int32, (B, S, S), 2)
    perm = ((t_i + s_i == lens3 - 1) & (t_i < lens3)).astype(jnp.float32)
    t_pos = lax.broadcasted_iota(jnp.int32, (B, S, 1), 1)
    valid = (t_pos < lens3).astype(jnp.float32)                       # (B, S, 1)
    negpad = jnp.where(t_pos < lens3, 0.0, NEG).astype(jnp.float32)   # (B, S, 1)

    out = pl.pallas_call(
        ner_fused_kernel,
        out_shape=jax.ShapeDtypeStruct((B, S, TT_PAD), jnp.float32),
        compiler_params=pltpu.CompilerParams(vmem_limit_bytes=32 * 1024 * 1024),
    )(word_emb, im2col, params["conv_w_mat"], params["conv_b"],
      params["wih_f_big"], params["wih_b_big"], params["whh_big"], params["bias_big"],
      params["crf_w_pad"], params["crf_b_pad"], params["crf_keep"], params["crf_static"],
      perm, valid, negpad)

    # slice off the lane padding and expose (B, S, T, T)
    return out[:, :, :TT].reshape(B, S, NUM_TAGS, NUM_TAGS)


def ner_forward(params, sequences, lengths, chars):
    """Equivalent of NERModel.forward (eval mode)."""
    lens_arr = jnp.asarray(lengths, jnp.int32)
    trans = _ner_forward_jit(params, sequences, lens_arr, chars)
    max_len = int(max(lengths))          # pad_packed_sequence output length
    return trans[:, :max_len]


# ---------------- parameters ----------------

def init_params(key):
    """Raw parameters in PyTorch layouts (deterministic)."""
    keys = jax.random.split(key, 14)
    rn = lambda k, shape, s=0.1: jax.random.normal(k, shape, jnp.float32) * s
    Din = WORD_DIM + CHAR_DIM
    char_embed = rn(keys[1], (NUM_CHARS, CHAR_DIM), 0.5).at[CHAR_PAD].set(0.0)
    return {
        "word_embed": rn(keys[0], (VOCAB, WORD_DIM), 0.5),        # pretrain_word_embedding
        "char_embed": char_embed,
        "conv_w": rn(keys[2], (CHAR_DIM, CHAR_DIM, KSIZE)),       # Conv1d weight (Cout, Cin, K)
        "conv_b": rn(keys[3], (CHAR_DIM,)),
        "wih_f": rn(keys[4], (4 * HIDDEN, Din)),
        "whh_f": rn(keys[5], (4 * HIDDEN, HIDDEN)),
        "bih_f": rn(keys[6], (4 * HIDDEN,)),
        "bhh_f": rn(keys[7], (4 * HIDDEN,)),
        "wih_b": rn(keys[8], (4 * HIDDEN, Din)),
        "whh_b": rn(keys[9], (4 * HIDDEN, HIDDEN)),
        "bih_b": rn(keys[10], (4 * HIDDEN,)),
        "bhh_b": rn(keys[11], (4 * HIDDEN,)),
        "crf_w": rn(keys[12], (NUM_TAGS * NUM_TAGS, 2 * HIDDEN)),  # Linear(2H, T*T) weight
        "crf_b": rn(keys[13], (NUM_TAGS * NUM_TAGS,)),
    }


def prepare_params(raw):
    """One-time repacking of raw (torch-layout) params into kernel layouts."""
    H = HIDDEN
    T = NUM_TAGS

    def interleave(f_mat, b_mat):
        # f_mat, b_mat: (X, 4H) gate-blocked [i,f,g,o] -> (X, 8H) [i_f,i_b,f_f,f_b,...]
        cols = []
        for g in range(4):
            cols.append(f_mat[:, g * H:(g + 1) * H])
            cols.append(b_mat[:, g * H:(g + 1) * H])
        return jnp.concatenate(cols, axis=1)

    wih_f_t, wih_b_t = raw["wih_f"].T, raw["wih_b"].T          # (Din, 4H)
    whh_f_t, whh_b_t = raw["whh_f"].T, raw["whh_b"].T          # (H, 4H)
    zeros_i = jnp.zeros_like(wih_f_t)
    zeros_h = jnp.zeros_like(whh_f_t)
    # direction-masked input projections (reversal applied in input space)
    wih_f_big = interleave(wih_f_t, zeros_i).astype(jnp.bfloat16)     # (Din, 8H)
    wih_b_big = interleave(zeros_i, wih_b_t).astype(jnp.bfloat16)     # (Din, 8H)
    whh_big = jnp.concatenate([interleave(whh_f_t, zeros_h),
                               interleave(zeros_h, whh_b_t)],
                              axis=0).astype(jnp.bfloat16)            # (2H, 8H)
    bias_big = interleave((raw["bih_f"] + raw["bhh_f"])[None, :],
                          (raw["bih_b"] + raw["bhh_b"])[None, :])     # (1, 8H) f32

    # im2col conv weight: rows ordered k-major then cin, matching patch flattening
    conv_w_mat = jnp.transpose(raw["conv_w"], (2, 1, 0)).reshape(
        KSIZE * CHAR_DIM, CHAR_DIM).astype(jnp.bfloat16)
    conv_b = raw["conv_b"].reshape(1, CHAR_DIM)

    # CRF weight/bias padded to 128 lane-dense output columns
    crf_w_pad = jnp.zeros((2 * H, TT_PAD), jnp.float32
                          ).at[:, :TT].set(raw["crf_w"].T).astype(jnp.bfloat16)
    crf_b_pad = jnp.zeros((1, TT_PAD), jnp.float32).at[:, :TT].set(raw["crf_b"][None, :])

    # Static CRF masks folded into a (keep, static) pair.
    #   keep==1: value = length-masked linear output
    #   keep==0: value = static (NEG for col==START or (row==START & t>=1), 0 for (END,END))
    keep = np.ones((1, SEQ_LEN, TT_PAD), np.float32)
    stat = np.zeros((1, SEQ_LEN, TT_PAD), np.float32)
    keep[:, :, TT:] = 0.0                                      # padded cols -> 0
    for t in range(SEQ_LEN):
        for idx in range(TT):
            r, c = idx // T, idx % T
            if c == START_ID:
                keep[0, t, idx] = 0.0
                stat[0, t, idx] = NEG
            elif r == START_ID and t >= 1:
                keep[0, t, idx] = 0.0
                stat[0, t, idx] = NEG
            elif r == END_ID and c == END_ID:
                keep[0, t, idx] = 0.0
                stat[0, t, idx] = 0.0
    crf_keep = jnp.asarray(keep)
    crf_static = jnp.asarray(stat)

    return {
        "word_embed": raw["word_embed"], "char_embed": raw["char_embed"],
        "conv_w_mat": conv_w_mat, "conv_b": conv_b,
        "wih_f_big": wih_f_big, "wih_b_big": wih_b_big,
        "whh_big": whh_big, "bias_big": bias_big,
        "crf_w_pad": crf_w_pad, "crf_b_pad": crf_b_pad,
        "crf_keep": crf_keep, "crf_static": crf_static,
    }


if __name__ == "__main__":
    key = jax.random.PRNGKey(0)
    pkey, skey, ckey = jax.random.split(key, 3)
    params = prepare_params(init_params(pkey))

    lengths = [SEQ_LEN, 5]                                    # max(lengths) == SEQ_LEN
    sequences = jax.random.randint(skey, (BSZ, SEQ_LEN), 1, VOCAB, dtype=jnp.int32)
    chars = jax.random.randint(ckey, (BSZ, SEQ_LEN, MAX_CHAR_LEN), 1, NUM_CHARS,
                               dtype=jnp.int32)

    transition = ner_forward(params, sequences, lengths, chars)
    jax.block_until_ready(transition)
    assert transition.shape == (BSZ, SEQ_LEN, NUM_TAGS, NUM_TAGS)
    assert transition.dtype == jnp.float32
    print("KERNEL_OK")
</pallas_src>

<mosaic_0001>
module attributes {stable_mosaic.version = 11 : i64} {
  func.func @ner_fused_kernel(%arg0: memref<2x8x16xf32, #tpu.memory_space<vmem>>, %arg1: memref<6x16x24xbf16, #tpu.memory_space<vmem>>, %arg2: memref<24x8xbf16, #tpu.memory_space<vmem>>, %arg3: memref<1x8xf32, #tpu.memory_space<vmem>>, %arg4: memref<24x256xbf16, #tpu.memory_space<vmem>>, %arg5: memref<24x256xbf16, #tpu.memory_space<vmem>>, %arg6: memref<64x256xbf16, #tpu.memory_space<vmem>>, %arg7: memref<1x256xf32, #tpu.memory_space<vmem>>, %arg8: memref<64x128xbf16, #tpu.memory_space<vmem>>, %arg9: memref<1x128xf32, #tpu.memory_space<vmem>>, %arg10: memref<1x8x128xf32, #tpu.memory_space<vmem>>, %arg11: memref<1x8x128xf32, #tpu.memory_space<vmem>>, %arg12: memref<2x8x8xf32, #tpu.memory_space<vmem>>, %arg13: memref<2x8x1xf32, #tpu.memory_space<vmem>>, %arg14: memref<2x8x1xf32, #tpu.memory_space<vmem>>, %arg15: memref<2x8x128xf32, #tpu.memory_space<vmem>>) attributes {dimension_semantics = [], scalar_prefetch = 0 : i64, scratch_operands = 0 : i64, tpu.core_type = #tpu.core_type<tc>} {
    %c0 = arith.constant 0 : index
    %c0_0 = arith.constant 0 : index
    %0 = vector.load %arg2[%c0, %c0_0] : memref<24x8xbf16, #tpu.memory_space<vmem>>, vector<24x8xbf16>
    %c0_1 = arith.constant 0 : index
    %c0_2 = arith.constant 0 : index
    %c0_3 = arith.constant 0 : index
    %1 = vector.load %arg1[%c0_1, %c0_2, %c0_3] : memref<6x16x24xbf16, #tpu.memory_space<vmem>>, vector<1x16x24xbf16>
    %2 = vector.shape_cast %1 : vector<1x16x24xbf16> to vector<16x24xbf16>
    %cst = arith.constant dense<0.000000e+00> : vector<16x8xf32>
    %3 = tpu.matmul %2, %0, %cst {dimension_numbers = #tpu.dot_dimension_numbers<[1], [0], [0], [1], [0, 0, 1, 1], [], []>} : vector<16x24xbf16>, vector<24x8xbf16>, vector<16x8xf32> -> vector<16x8xf32>
    %c1 = arith.constant 1 : index
    %c0_4 = arith.constant 0 : index
    %c0_5 = arith.constant 0 : index
    %4 = vector.load %arg1[%c1, %c0_4, %c0_5] : memref<6x16x24xbf16, #tpu.memory_space<vmem>>, vector<1x16x24xbf16>
    %5 = vector.shape_cast %4 : vector<1x16x24xbf16> to vector<16x24xbf16>
    %cst_6 = arith.constant dense<0.000000e+00> : vector<16x8xf32>
    %6 = tpu.matmul %5, %0, %cst_6 {dimension_numbers = #tpu.dot_dimension_numbers<[1], [0], [0], [1], [0, 0, 1, 1], [], []>} : vector<16x24xbf16>, vector<24x8xbf16>, vector<16x8xf32> -> vector<16x8xf32>
    %7 = arith.maximumf %3, %6 : vector<16x8xf32>
    %c2 = arith.constant 2 : index
    %c0_7 = arith.constant 0 : index
    %c0_8 = arith.constant 0 : index
    %8 = vector.load %arg1[%c2, %c0_7, %c0_8] : memref<6x16x24xbf16, #tpu.memory_space<vmem>>, vector<1x16x24xbf16>
    %9 = vector.shape_cast %8 : vector<1x16x24xbf16> to vector<16x24xbf16>
    %cst_9 = arith.constant dense<0.000000e+00> : vector<16x8xf32>
    %10 = tpu.matmul %9, %0, %cst_9 {dimension_numbers = #tpu.dot_dimension_numbers<[1], [0], [0], [1], [0, 0, 1, 1], [], []>} : vector<16x24xbf16>, vector<24x8xbf16>, vector<16x8xf32> -> vector<16x8xf32>
    %11 = arith.maximumf %7, %10 : vector<16x8xf32>
    %c3 = arith.constant 3 : index
    %c0_10 = arith.constant 0 : index
    %c0_11 = arith.constant 0 : index
    %12 = vector.load %arg1[%c3, %c0_10, %c0_11] : memref<6x16x24xbf16, #tpu.memory_space<vmem>>, vector<1x16x24xbf16>
    %13 = vector.shape_cast %12 : vector<1x16x24xbf16> to vector<16x24xbf16>
    %cst_12 = arith.constant dense<0.000000e+00> : vector<16x8xf32>
    %14 = tpu.matmul %13, %0, %cst_12 {dimension_numbers = #tpu.dot_dimension_numbers<[1], [0], [0], [1], [0, 0, 1, 1], [], []>} : vector<16x24xbf16>, vector<24x8xbf16>, vector<16x8xf32> -> vector<16x8xf32>
    %15 = arith.maximumf %11, %14 : vector<16x8xf32>
    %c4 = arith.constant 4 : index
    %c0_13 = arith.constant 0 : index
    %c0_14 = arith.constant 0 : index
    %16 = vector.load %arg1[%c4, %c0_13, %c0_14] : memref<6x16x24xbf16, #tpu.memory_space<vmem>>, vector<1x16x24xbf16>
    %17 = vector.shape_cast %16 : vector<1x16x24xbf16> to vector<16x24xbf16>
    %cst_15 = arith.constant dense<0.000000e+00> : vector<16x8xf32>
    %18 = tpu.matmul %17, %0, %cst_15 {dimension_numbers = #tpu.dot_dimension_numbers<[1], [0], [0], [1], [0, 0, 1, 1], [], []>} : vector<16x24xbf16>, vector<24x8xbf16>, vector<16x8xf32> -> vector<16x8xf32>
    %19 = arith.maximumf %15, %18 : vector<16x8xf32>
    %c5 = arith.constant 5 : index
    %c0_16 = arith.constant 0 : index
    %c0_17 = arith.constant 0 : index
    %20 = vector.load %arg1[%c5, %c0_16, %c0_17] : memref<6x16x24xbf16, #tpu.memory_space<vmem>>, vector<1x16x24xbf16>
    %21 = vector.shape_cast %20 : vector<1x16x24xbf16> to vector<16x24xbf16>
    %cst_18 = arith.constant dense<0.000000e+00> : vector<16x8xf32>
    %22 = tpu.matmul %21, %0, %cst_18 {dimension_numbers = #tpu.dot_dimension_numbers<[1], [0], [0], [1], [0, 0, 1, 1], [], []>} : vector<16x24xbf16>, vector<24x8xbf16>, vector<16x8xf32> -> vector<16x8xf32>
    %23 = arith.maximumf %19, %22 : vector<16x8xf32>
    %c0_19 = arith.constant 0 : index
    %c0_20 = arith.constant 0 : index
    %24 = vector.load %arg3[%c0_19, %c0_20] : memref<1x8xf32, #tpu.memory_space<vmem>>, vector<1x8xf32>
    %25 = vector.shape_cast %24 : vector<1x8xf32> to vector<8xf32>
    %26 = vector.shape_cast %25 : vector<8xf32> to vector<1x8xf32>
    %27 = vector.broadcast %26 : vector<1x8xf32> to vector<16x8xf32>
    %28 = arith.addf %23, %27 : vector<16x8xf32>
    %29 = vector.shape_cast %28 : vector<16x8xf32> to vector<2x8x8xf32>
    %c0_21 = arith.constant 0 : index
    %c0_22 = arith.constant 0 : index
    %c0_23 = arith.constant 0 : index
    %30 = vector.load %arg0[%c0_21, %c0_22, %c0_23] : memref<2x8x16xf32, #tpu.memory_space<vmem>>, vector<2x8x16xf32>
    %31 = tpu.concatenate %30, %29 in 2 : vector<2x8x16xf32>, vector<2x8x8xf32> -> vector<2x8x24xf32>
    %c0_24 = arith.constant 0 : index
    %c0_25 = arith.constant 0 : index
    %c0_26 = arith.constant 0 : index
    %32 = vector.load %arg12[%c0_24, %c0_25, %c0_26] : memref<2x8x8xf32, #tpu.memory_space<vmem>>, vector<2x8x8xf32>
    "tpu.trace_start"() <{level = 10 : i32, message = "bts,bsd->btd"}> : () -> ()
    %cst_27 = arith.constant dense<0.000000e+00> : vector<2x8x24xf32>
    %33 = tpu.matmul %32, %31, %cst_27 {dimension_numbers = #tpu.dot_dimension_numbers<[2], [1], [1], [2], [0, 0, 0, 1, 1, 2], [0], [0]>} : vector<2x8x8xf32>, vector<2x8x24xf32>, vector<2x8x24xf32> -> vector<2x8x24xf32>
    "tpu.trace_stop"() : () -> ()
    %34 = vector.shape_cast %31 : vector<2x8x24xf32> to vector<16x24xf32>
    %35 = arith.truncf %34 : vector<16x24xf32> to vector<16x24xbf16>
    %36 = vector.shape_cast %33 : vector<2x8x24xf32> to vector<16x24xf32>
    %37 = arith.truncf %36 : vector<16x24xf32> to vector<16x24xbf16>
    %c0_28 = arith.constant 0 : index
    %c0_29 = arith.constant 0 : index
    %38 = vector.load %arg4[%c0_28, %c0_29] : memref<24x256xbf16, #tpu.memory_space<vmem>>, vector<24x256xbf16>
    %cst_30 = arith.constant dense<0.000000e+00> : vector<16x256xf32>
    %39 = tpu.matmul %35, %38, %cst_30 {dimension_numbers = #tpu.dot_dimension_numbers<[1], [0], [0], [1], [0, 0, 1, 1], [], []>} : vector<16x24xbf16>, vector<24x256xbf16>, vector<16x256xf32> -> vector<16x256xf32>
    %c0_31 = arith.constant 0 : index
    %c0_32 = arith.constant 0 : index
    %40 = vector.load %arg5[%c0_31, %c0_32] : memref<24x256xbf16, #tpu.memory_space<vmem>>, vector<24x256xbf16>
    %cst_33 = arith.constant dense<0.000000e+00> : vector<16x256xf32>
    %41 = tpu.matmul %37, %40, %cst_33 {dimension_numbers = #tpu.dot_dimension_numbers<[1], [0], [0], [1], [0, 0, 1, 1], [], []>} : vector<16x24xbf16>, vector<24x256xbf16>, vector<16x256xf32> -> vector<16x256xf32>
    %42 = arith.addf %39, %41 : vector<16x256xf32>
    %c0_34 = arith.constant 0 : index
    %c0_35 = arith.constant 0 : index
    %43 = vector.load %arg7[%c0_34, %c0_35] : memref<1x256xf32, #tpu.memory_space<vmem>>, vector<1x256xf32>
    %44 = vector.shape_cast %43 : vector<1x256xf32> to vector<256xf32>
    %45 = vector.shape_cast %44 : vector<256xf32> to vector<1x256xf32>
    %46 = vector.broadcast %45 : vector<1x256xf32> to vector<16x256xf32>
    %47 = arith.addf %42, %46 : vector<16x256xf32>
    %48 = vector.shape_cast %47 : vector<16x256xf32> to vector<2x8x256xf32>
    %c0_36 = arith.constant 0 : index
    %c0_37 = arith.constant 0 : index
    %49 = vector.load %arg6[%c0_36, %c0_37] : memref<64x256xbf16, #tpu.memory_space<vmem>>, vector<64x256xbf16>
    %cst_38 = arith.constant 0.000000e+00 : f32
    %50 = vector.broadcast %cst_38 : f32 to vector<2x64xf32>
    %cst_39 = arith.constant 0.000000e+00 : f32
    %51 = vector.broadcast %cst_39 : f32 to vector<2x64xf32>
    %52 = vector.extract_strided_slice %48 {offsets = [0, 0, 0], sizes = [2, 1, 256], strides = [1, 1, 1]} : vector<2x8x256xf32> to vector<2x1x256xf32>
    %53 = vector.shape_cast %52 : vector<2x1x256xf32> to vector<2x256xf32>
    %54 = arith.truncf %50 : vector<2x64xf32> to vector<2x64xbf16>
    %cst_40 = arith.constant dense<0.000000e+00> : vector<2x256xf32>
    %55 = tpu.matmul %54, %49, %cst_40 {dimension_numbers = #tpu.dot_dimension_numbers<[1], [0], [0], [1], [0, 0, 1, 1], [], []>} : vector<2x64xbf16>, vector<64x256xbf16>, vector<2x256xf32> -> vector<2x256xf32>
    %56 = arith.addf %53, %55 : vector<2x256xf32>
    %57 = vector.extract_strided_slice %56 {offsets = [0, 0], sizes = [2, 64], strides = [1, 1]} : vector<2x256xf32> to vector<2x64xf32>
    %58 = arith.negf %57 : vector<2x64xf32>
    %59 = math.exp %58 : vector<2x64xf32>
    %cst_41 = arith.constant 1.000000e+00 : f32
    %60 = vector.broadcast %cst_41 : f32 to vector<2x64xf32>
    %61 = arith.addf %60, %59 : vector<2x64xf32>
    %62 = arith.divf %60, %61 : vector<2x64xf32>
    %63 = vector.extract_strided_slice %56 {offsets = [0, 64], sizes = [2, 64], strides = [1, 1]} : vector<2x256xf32> to vector<2x64xf32>
    %64 = arith.negf %63 : vector<2x64xf32>
    %65 = math.exp %64 : vector<2x64xf32>
    %cst_42 = arith.constant 1.000000e+00 : f32
    %66 = vector.broadcast %cst_42 : f32 to vector<2x64xf32>
    %67 = arith.addf %66, %65 : vector<2x64xf32>
    %68 = arith.divf %66, %67 : vector<2x64xf32>
    %69 = vector.extract_strided_slice %56 {offsets = [0, 128], sizes = [2, 64], strides = [1, 1]} : vector<2x256xf32> to vector<2x64xf32>
    %70 = math.tanh %69 : vector<2x64xf32>
    %71 = vector.extract_strided_slice %56 {offsets = [0, 192], sizes = [2, 64], strides = [1, 1]} : vector<2x256xf32> to vector<2x64xf32>
    %72 = arith.negf %71 : vector<2x64xf32>
    %73 = math.exp %72 : vector<2x64xf32>
    %cst_43 = arith.constant 1.000000e+00 : f32
    %74 = vector.broadcast %cst_43 : f32 to vector<2x64xf32>
    %75 = arith.addf %74, %73 : vector<2x64xf32>
    %76 = arith.divf %74, %75 : vector<2x64xf32>
    %77 = arith.mulf %68, %51 : vector<2x64xf32>
    %78 = arith.mulf %62, %70 : vector<2x64xf32>
    %79 = arith.addf %77, %78 : vector<2x64xf32>
    %80 = math.tanh %79 : vector<2x64xf32>
    %81 = arith.mulf %76, %80 : vector<2x64xf32>
    %82 = vector.extract_strided_slice %48 {offsets = [0, 1, 0], sizes = [2, 1, 256], strides = [1, 1, 1]} : vector<2x8x256xf32> to vector<2x1x256xf32>
    %83 = vector.shape_cast %82 : vector<2x1x256xf32> to vector<2x256xf32>
    %84 = arith.truncf %81 : vector<2x64xf32> to vector<2x64xbf16>
    %cst_44 = arith.constant dense<0.000000e+00> : vector<2x256xf32>
    %85 = tpu.matmul %84, %49, %cst_44 {dimension_numbers = #tpu.dot_dimension_numbers<[1], [0], [0], [1], [0, 0, 1, 1], [], []>} : vector<2x64xbf16>, vector<64x256xbf16>, vector<2x256xf32> -> vector<2x256xf32>
    %86 = arith.addf %83, %85 : vector<2x256xf32>
    %87 = vector.extract_strided_slice %86 {offsets = [0, 0], sizes = [2, 64], strides = [1, 1]} : vector<2x256xf32> to vector<2x64xf32>
    %88 = arith.negf %87 : vector<2x64xf32>
    %89 = math.exp %88 : vector<2x64xf32>
    %cst_45 = arith.constant 1.000000e+00 : f32
    %90 = vector.broadcast %cst_45 : f32 to vector<2x64xf32>
    %91 = arith.addf %90, %89 : vector<2x64xf32>
    %92 = arith.divf %90, %91 : vector<2x64xf32>
    %93 = vector.extract_strided_slice %86 {offsets = [0, 64], sizes = [2, 64], strides = [1, 1]} : vector<2x256xf32> to vector<2x64xf32>
    %94 = arith.negf %93 : vector<2x64xf32>
    %95 = math.exp %94 : vector<2x64xf32>
    %cst_46 = arith.constant 1.000000e+00 : f32
    %96 = vector.broadcast %cst_46 : f32 to vector<2x64xf32>
    %97 = arith.addf %96, %95 : vector<2x64xf32>
    %98 = arith.divf %96, %97 : vector<2x64xf32>
    %99 = vector.extract_strided_slice %86 {offsets = [0, 128], sizes = [2, 64], strides = [1, 1]} : vector<2x256xf32> to vector<2x64xf32>
    %100 = math.tanh %99 : vector<2x64xf32>
    %101 = vector.extract_strided_slice %86 {offsets = [0, 192], sizes = [2, 64], strides = [1, 1]} : vector<2x256xf32> to vector<2x64xf32>
    %102 = arith.negf %101 : vector<2x64xf32>
    %103 = math.exp %102 : vector<2x64xf32>
    %cst_47 = arith.constant 1.000000e+00 : f32
    %104 = vector.broadcast %cst_47 : f32 to vector<2x64xf32>
    %105 = arith.addf %104, %103 : vector<2x64xf32>
    %106 = arith.divf %104, %105 : vector<2x64xf32>
    %107 = arith.mulf %98, %79 : vector<2x64xf32>
    %108 = arith.mulf %92, %100 : vector<2x64xf32>
    %109 = arith.addf %107, %108 : vector<2x64xf32>
    %110 = math.tanh %109 : vector<2x64xf32>
    %111 = arith.mulf %106, %110 : vector<2x64xf32>
    %112 = vector.extract_strided_slice %48 {offsets = [0, 2, 0], sizes = [2, 1, 256], strides = [1, 1, 1]} : vector<2x8x256xf32> to vector<2x1x256xf32>
    %113 = vector.shape_cast %112 : vector<2x1x256xf32> to vector<2x256xf32>
    %114 = arith.truncf %111 : vector<2x64xf32> to vector<2x64xbf16>
    %cst_48 = arith.constant dense<0.000000e+00> : vector<2x256xf32>
    %115 = tpu.matmul %114, %49, %cst_48 {dimension_numbers = #tpu.dot_dimension_numbers<[1], [0], [0], [1], [0, 0, 1, 1], [], []>} : vector<2x64xbf16>, vector<64x256xbf16>, vector<2x256xf32> -> vector<2x256xf32>
    %116 = arith.addf %113, %115 : vector<2x256xf32>
    %117 = vector.extract_strided_slice %116 {offsets = [0, 0], sizes = [2, 64], strides = [1, 1]} : vector<2x256xf32> to vector<2x64xf32>
    %118 = arith.negf %117 : vector<2x64xf32>
    %119 = math.exp %118 : vector<2x64xf32>
    %cst_49 = arith.constant 1.000000e+00 : f32
    %120 = vector.broadcast %cst_49 : f32 to vector<2x64xf32>
    %121 = arith.addf %120, %119 : vector<2x64xf32>
    %122 = arith.divf %120, %121 : vector<2x64xf32>
    %123 = vector.extract_strided_slice %116 {offsets = [0, 64], sizes = [2, 64], strides = [1, 1]} : vector<2x256xf32> to vector<2x64xf32>
    %124 = arith.negf %123 : vector<2x64xf32>
    %125 = math.exp %124 : vector<2x64xf32>
    %cst_50 = arith.constant 1.000000e+00 : f32
    %126 = vector.broadcast %cst_50 : f32 to vector<2x64xf32>
    %127 = arith.addf %126, %125 : vector<2x64xf32>
    %128 = arith.divf %126, %127 : vector<2x64xf32>
    %129 = vector.extract_strided_slice %116 {offsets = [0, 128], sizes = [2, 64], strides = [1, 1]} : vector<2x256xf32> to vector<2x64xf32>
    %130 = math.tanh %129 : vector<2x64xf32>
    %131 = vector.extract_strided_slice %116 {offsets = [0, 192], sizes = [2, 64], strides = [1, 1]} : vector<2x256xf32> to vector<2x64xf32>
    %132 = arith.negf %131 : vector<2x64xf32>
    %133 = math.exp %132 : vector<2x64xf32>
    %cst_51 = arith.constant 1.000000e+00 : f32
    %134 = vector.broadcast %cst_51 : f32 to vector<2x64xf32>
    %135 = arith.addf %134, %133 : vector<2x64xf32>
    %136 = arith.divf %134, %135 : vector<2x64xf32>
    %137 = arith.mulf %128, %109 : vector<2x64xf32>
    %138 = arith.mulf %122, %130 : vector<2x64xf32>
    %139 = arith.addf %137, %138 : vector<2x64xf32>
    %140 = math.tanh %139 : vector<2x64xf32>
    %141 = arith.mulf %136, %140 : vector<2x64xf32>
    %142 = vector.extract_strided_slice %48 {offsets = [0, 3, 0], sizes = [2, 1, 256], strides = [1, 1, 1]} : vector<2x8x256xf32> to vector<2x1x256xf32>
    %143 = vector.shape_cast %142 : vector<2x1x256xf32> to vector<2x256xf32>
    %144 = arith.truncf %141 : vector<2x64xf32> to vector<2x64xbf16>
    %cst_52 = arith.constant dense<0.000000e+00> : vector<2x256xf32>
    %145 = tpu.matmul %144, %49, %cst_52 {dimension_numbers = #tpu.dot_dimension_numbers<[1], [0], [0], [1], [0, 0, 1, 1], [], []>} : vector<2x64xbf16>, vector<64x256xbf16>, vector<2x256xf32> -> vector<2x256xf32>
    %146 = arith.addf %143, %145 : vector<2x256xf32>
    %147 = vector.extract_strided_slice %146 {offsets = [0, 0], sizes = [2, 64], strides = [1, 1]} : vector<2x256xf32> to vector<2x64xf32>
    %148 = arith.negf %147 : vector<2x64xf32>
    %149 = math.exp %148 : vector<2x64xf32>
    %cst_53 = arith.constant 1.000000e+00 : f32
    %150 = vector.broadcast %cst_53 : f32 to vector<2x64xf32>
    %151 = arith.addf %150, %149 : vector<2x64xf32>
    %152 = arith.divf %150, %151 : vector<2x64xf32>
    %153 = vector.extract_strided_slice %146 {offsets = [0, 64], sizes = [2, 64], strides = [1, 1]} : vector<2x256xf32> to vector<2x64xf32>
    %154 = arith.negf %153 : vector<2x64xf32>
    %155 = math.exp %154 : vector<2x64xf32>
    %cst_54 = arith.constant 1.000000e+00 : f32
    %156 = vector.broadcast %cst_54 : f32 to vector<2x64xf32>
    %157 = arith.addf %156, %155 : vector<2x64xf32>
    %158 = arith.divf %156, %157 : vector<2x64xf32>
    %159 = vector.extract_strided_slice %146 {offsets = [0, 128], sizes = [2, 64], strides = [1, 1]} : vector<2x256xf32> to vector<2x64xf32>
    %160 = math.tanh %159 : vector<2x64xf32>
    %161 = vector.extract_strided_slice %146 {offsets = [0, 192], sizes = [2, 64], strides = [1, 1]} : vector<2x256xf32> to vector<2x64xf32>
    %162 = arith.negf %161 : vector<2x64xf32>
    %163 = math.exp %162 : vector<2x64xf32>
    %cst_55 = arith.constant 1.000000e+00 : f32
    %164 = vector.broadcast %cst_55 : f32 to vector<2x64xf32>
    %165 = arith.addf %164, %163 : vector<2x64xf32>
    %166 = arith.divf %164, %165 : vector<2x64xf32>
    %167 = arith.mulf %158, %139 : vector<2x64xf32>
    %168 = arith.mulf %152, %160 : vector<2x64xf32>
    %169 = arith.addf %167, %168 : vector<2x64xf32>
    %170 = math.tanh %169 : vector<2x64xf32>
    %171 = arith.mulf %166, %170 : vector<2x64xf32>
    %172 = vector.extract_strided_slice %48 {offsets = [0, 4, 0], sizes = [2, 1, 256], strides = [1, 1, 1]} : vector<2x8x256xf32> to vector<2x1x256xf32>
    %173 = vector.shape_cast %172 : vector<2x1x256xf32> to vector<2x256xf32>
    %174 = arith.truncf %171 : vector<2x64xf32> to vector<2x64xbf16>
    %cst_56 = arith.constant dense<0.000000e+00> : vector<2x256xf32>
    %175 = tpu.matmul %174, %49, %cst_56 {dimension_numbers = #tpu.dot_dimension_numbers<[1], [0], [0], [1], [0, 0, 1, 1], [], []>} : vector<2x64xbf16>, vector<64x256xbf16>, vector<2x256xf32> -> vector<2x256xf32>
    %176 = arith.addf %173, %175 : vector<2x256xf32>
    %177 = vector.extract_strided_slice %176 {offsets = [0, 0], sizes = [2, 64], strides = [1, 1]} : vector<2x256xf32> to vector<2x64xf32>
    %178 = arith.negf %177 : vector<2x64xf32>
    %179 = math.exp %178 : vector<2x64xf32>
    %cst_57 = arith.constant 1.000000e+00 : f32
    %180 = vector.broadcast %cst_57 : f32 to vector<2x64xf32>
    %181 = arith.addf %180, %179 : vector<2x64xf32>
    %182 = arith.divf %180, %181 : vector<2x64xf32>
    %183 = vector.extract_strided_slice %176 {offsets = [0, 64], sizes = [2, 64], strides = [1, 1]} : vector<2x256xf32> to vector<2x64xf32>
    %184 = arith.negf %183 : vector<2x64xf32>
    %185 = math.exp %184 : vector<2x64xf32>
    %cst_58 = arith.constant 1.000000e+00 : f32
    %186 = vector.broadcast %cst_58 : f32 to vector<2x64xf32>
    %187 = arith.addf %186, %185 : vector<2x64xf32>
    %188 = arith.divf %186, %187 : vector<2x64xf32>
    %189 = vector.extract_strided_slice %176 {offsets = [0, 128], sizes = [2, 64], strides = [1, 1]} : vector<2x256xf32> to vector<2x64xf32>
    %190 = math.tanh %189 : vector<2x64xf32>
    %191 = vector.extract_strided_slice %176 {offsets = [0, 192], sizes = [2, 64], strides = [1, 1]} : vector<2x256xf32> to vector<2x64xf32>
    %192 = arith.negf %191 : vector<2x64xf32>
    %193 = math.exp %192 : vector<2x64xf32>
    %cst_59 = arith.constant 1.000000e+00 : f32
    %194 = vector.broadcast %cst_59 : f32 to vector<2x64xf32>
    %195 = arith.addf %194, %193 : vector<2x64xf32>
    %196 = arith.divf %194, %195 : vector<2x64xf32>
    %197 = arith.mulf %188, %169 : vector<2x64xf32>
    %198 = arith.mulf %182, %190 : vector<2x64xf32>
    %199 = arith.addf %197, %198 : vector<2x64xf32>
    %200 = math.tanh %199 : vector<2x64xf32>
    %201 = arith.mulf %196, %200 : vector<2x64xf32>
    %202 = vector.extract_strided_slice %48 {offsets = [0, 5, 0], sizes = [2, 1, 256], strides = [1, 1, 1]} : vector<2x8x256xf32> to vector<2x1x256xf32>
    %203 = vector.shape_cast %202 : vector<2x1x256xf32> to vector<2x256xf32>
    %204 = arith.truncf %201 : vector<2x64xf32> to vector<2x64xbf16>
    %cst_60 = arith.constant dense<0.000000e+00> : vector<2x256xf32>
    %205 = tpu.matmul %204, %49, %cst_60 {dimension_numbers = #tpu.dot_dimension_numbers<[1], [0], [0], [1], [0, 0, 1, 1], [], []>} : vector<2x64xbf16>, vector<64x256xbf16>, vector<2x256xf32> -> vector<2x256xf32>
    %206 = arith.addf %203, %205 : vector<2x256xf32>
    %207 = vector.extract_strided_slice %206 {offsets = [0, 0], sizes = [2, 64], strides = [1, 1]} : vector<2x256xf32> to vector<2x64xf32>
    %208 = arith.negf %207 : vector<2x64xf32>
    %209 = math.exp %208 : vector<2x64xf32>
    %cst_61 = arith.constant 1.000000e+00 : f32
    %210 = vector.broadcast %cst_61 : f32 to vector<2x64xf32>
    %211 = arith.addf %210, %209 : vector<2x64xf32>
    %212 = arith.divf %210, %211 : vector<2x64xf32>
    %213 = vector.extract_strided_slice %206 {offsets = [0, 64], sizes = [2, 64], strides = [1, 1]} : vector<2x256xf32> to vector<2x64xf32>
    %214 = arith.negf %213 : vector<2x64xf32>
    %215 = math.exp %214 : vector<2x64xf32>
    %cst_62 = arith.constant 1.000000e+00 : f32
    %216 = vector.broadcast %cst_62 : f32 to vector<2x64xf32>
    %217 = arith.addf %216, %215 : vector<2x64xf32>
    %218 = arith.divf %216, %217 : vector<2x64xf32>
    %219 = vector.extract_strided_slice %206 {offsets = [0, 128], sizes = [2, 64], strides = [1, 1]} : vector<2x256xf32> to vector<2x64xf32>
    %220 = math.tanh %219 : vector<2x64xf32>
    %221 = vector.extract_strided_slice %206 {offsets = [0, 192], sizes = [2, 64], strides = [1, 1]} : vector<2x256xf32> to vector<2x64xf32>
    %222 = arith.negf %221 : vector<2x64xf32>
    %223 = math.exp %222 : vector<2x64xf32>
    %cst_63 = arith.constant 1.000000e+00 : f32
    %224 = vector.broadcast %cst_63 : f32 to vector<2x64xf32>
    %225 = arith.addf %224, %223 : vector<2x64xf32>
    %226 = arith.divf %224, %225 : vector<2x64xf32>
    %227 = arith.mulf %218, %199 : vector<2x64xf32>
    %228 = arith.mulf %212, %220 : vector<2x64xf32>
    %229 = arith.addf %227, %228 : vector<2x64xf32>
    %230 = math.tanh %229 : vector<2x64xf32>
    %231 = arith.mulf %226, %230 : vector<2x64xf32>
    %232 = vector.extract_strided_slice %48 {offsets = [0, 6, 0], sizes = [2, 1, 256], strides = [1, 1, 1]} : vector<2x8x256xf32> to vector<2x1x256xf32>
    %233 = vector.shape_cast %232 : vector<2x1x256xf32> to vector<2x256xf32>
    %234 = arith.truncf %231 : vector<2x64xf32> to vector<2x64xbf16>
    %cst_64 = arith.constant dense<0.000000e+00> : vector<2x256xf32>
    %235 = tpu.matmul %234, %49, %cst_64 {dimension_numbers = #tpu.dot_dimension_numbers<[1], [0], [0], [1], [0, 0, 1, 1], [], []>} : vector<2x64xbf16>, vector<64x256xbf16>, vector<2x256xf32> -> vector<2x256xf32>
    %236 = arith.addf %233, %235 : vector<2x256xf32>
    %237 = vector.extract_strided_slice %236 {offsets = [0, 0], sizes = [2, 64], strides = [1, 1]} : vector<2x256xf32> to vector<2x64xf32>
    %238 = arith.negf %237 : vector<2x64xf32>
    %239 = math.exp %238 : vector<2x64xf32>
    %cst_65 = arith.constant 1.000000e+00 : f32
    %240 = vector.broadcast %cst_65 : f32 to vector<2x64xf32>
    %241 = arith.addf %240, %239 : vector<2x64xf32>
    %242 = arith.divf %240, %241 : vector<2x64xf32>
    %243 = vector.extract_strided_slice %236 {offsets = [0, 64], sizes = [2, 64], strides = [1, 1]} : vector<2x256xf32> to vector<2x64xf32>
    %244 = arith.negf %243 : vector<2x64xf32>
    %245 = math.exp %244 : vector<2x64xf32>
    %cst_66 = arith.constant 1.000000e+00 : f32
    %246 = vector.broadcast %cst_66 : f32 to vector<2x64xf32>
    %247 = arith.addf %246, %245 : vector<2x64xf32>
    %248 = arith.divf %246, %247 : vector<2x64xf32>
    %249 = vector.extract_strided_slice %236 {offsets = [0, 128], sizes = [2, 64], strides = [1, 1]} : vector<2x256xf32> to vector<2x64xf32>
    %250 = math.tanh %249 : vector<2x64xf32>
    %251 = vector.extract_strided_slice %236 {offsets = [0, 192], sizes = [2, 64], strides = [1, 1]} : vector<2x256xf32> to vector<2x64xf32>
    %252 = arith.negf %251 : vector<2x64xf32>
    %253 = math.exp %252 : vector<2x64xf32>
    %cst_67 = arith.constant 1.000000e+00 : f32
    %254 = vector.broadcast %cst_67 : f32 to vector<2x64xf32>
    %255 = arith.addf %254, %253 : vector<2x64xf32>
    %256 = arith.divf %254, %255 : vector<2x64xf32>
    %257 = arith.mulf %248, %229 : vector<2x64xf32>
    %258 = arith.mulf %242, %250 : vector<2x64xf32>
    %259 = arith.addf %257, %258 : vector<2x64xf32>
    %260 = math.tanh %259 : vector<2x64xf32>
    %261 = arith.mulf %256, %260 : vector<2x64xf32>
    %262 = vector.extract_strided_slice %48 {offsets = [0, 7, 0], sizes = [2, 1, 256], strides = [1, 1, 1]} : vector<2x8x256xf32> to vector<2x1x256xf32>
    %263 = vector.shape_cast %262 : vector<2x1x256xf32> to vector<2x256xf32>
    %264 = arith.truncf %261 : vector<2x64xf32> to vector<2x64xbf16>
    %cst_68 = arith.constant dense<0.000000e+00> : vector<2x256xf32>
    %265 = tpu.matmul %264, %49, %cst_68 {dimension_numbers = #tpu.dot_dimension_numbers<[1], [0], [0], [1], [0, 0, 1, 1], [], []>} : vector<2x64xbf16>, vector<64x256xbf16>, vector<2x256xf32> -> vector<2x256xf32>
    %266 = arith.addf %263, %265 : vector<2x256xf32>
    %267 = vector.extract_strided_slice %266 {offsets = [0, 0], sizes = [2, 64], strides = [1, 1]} : vector<2x256xf32> to vector<2x64xf32>
    %268 = arith.negf %267 : vector<2x64xf32>
    %269 = math.exp %268 : vector<2x64xf32>
    %cst_69 = arith.constant 1.000000e+00 : f32
    %270 = vector.broadcast %cst_69 : f32 to vector<2x64xf32>
    %271 = arith.addf %270, %269 : vector<2x64xf32>
    %272 = arith.divf %270, %271 : vector<2x64xf32>
    %273 = vector.extract_strided_slice %266 {offsets = [0, 64], sizes = [2, 64], strides = [1, 1]} : vector<2x256xf32> to vector<2x64xf32>
    %274 = arith.negf %273 : vector<2x64xf32>
    %275 = math.exp %274 : vector<2x64xf32>
    %cst_70 = arith.constant 1.000000e+00 : f32
    %276 = vector.broadcast %cst_70 : f32 to vector<2x64xf32>
    %277 = arith.addf %276, %275 : vector<2x64xf32>
    %278 = arith.divf %276, %277 : vector<2x64xf32>
    %279 = vector.extract_strided_slice %266 {offsets = [0, 128], sizes = [2, 64], strides = [1, 1]} : vector<2x256xf32> to vector<2x64xf32>
    %280 = math.tanh %279 : vector<2x64xf32>
    %281 = vector.extract_strided_slice %266 {offsets = [0, 192], sizes = [2, 64], strides = [1, 1]} : vector<2x256xf32> to vector<2x64xf32>
    %282 = arith.negf %281 : vector<2x64xf32>
    %283 = math.exp %282 : vector<2x64xf32>
    %cst_71 = arith.constant 1.000000e+00 : f32
    %284 = vector.broadcast %cst_71 : f32 to vector<2x64xf32>
    %285 = arith.addf %284, %283 : vector<2x64xf32>
    %286 = arith.divf %284, %285 : vector<2x64xf32>
    %287 = arith.mulf %278, %259 : vector<2x64xf32>
    %288 = arith.mulf %272, %280 : vector<2x64xf32>
    %289 = arith.addf %287, %288 : vector<2x64xf32>
    %290 = math.tanh %289 : vector<2x64xf32>
    %291 = arith.mulf %286, %290 : vector<2x64xf32>
    %292 = vector.shape_cast %81 : vector<2x64xf32> to vector<2x1x64xf32>
    %293 = vector.shape_cast %111 : vector<2x64xf32> to vector<2x1x64xf32>
    %294 = vector.shape_cast %141 : vector<2x64xf32> to vector<2x1x64xf32>
    %295 = vector.shape_cast %171 : vector<2x64xf32> to vector<2x1x64xf32>
    %296 = vector.shape_cast %201 : vector<2x64xf32> to vector<2x1x64xf32>
    %297 = vector.shape_cast %231 : vector<2x64xf32> to vector<2x1x64xf32>
    %298 = vector.shape_cast %261 : vector<2x64xf32> to vector<2x1x64xf32>
    %299 = vector.shape_cast %291 : vector<2x64xf32> to vector<2x1x64xf32>
    %300 = tpu.concatenate %292, %293, %294, %295, %296, %297, %298, %299 in 1 : vector<2x1x64xf32>, vector<2x1x64xf32>, vector<2x1x64xf32>, vector<2x1x64xf32>, vector<2x1x64xf32>, vector<2x1x64xf32>, vector<2x1x64xf32>, vector<2x1x64xf32> -> vector<2x8x64xf32>
    %c0_72 = arith.constant 0 : index
    %c0_73 = arith.constant 0 : index
    %c0_74 = arith.constant 0 : index
    %301 = vector.load %arg13[%c0_72, %c0_73, %c0_74] : memref<2x8x1xf32, #tpu.memory_space<vmem>>, vector<2x8x1xf32>
    %302 = vector.extract_strided_slice %300 {offsets = [0, 0, 0], sizes = [2, 8, 32], strides = [1, 1, 1]} : vector<2x8x64xf32> to vector<2x8x32xf32>
    %303 = vector.broadcast %301 : vector<2x8x1xf32> to vector<2x8x32xf32>
    %304 = arith.mulf %302, %303 : vector<2x8x32xf32>
    %305 = vector.extract_strided_slice %300 {offsets = [0, 0, 32], sizes = [2, 8, 32], strides = [1, 1, 1]} : vector<2x8x64xf32> to vector<2x8x32xf32>
    "tpu.trace_start"() <{level = 10 : i32, message = "bts,bsh->bth"}> : () -> ()
    %cst_75 = arith.constant dense<0.000000e+00> : vector<2x8x32xf32>
    %306 = tpu.matmul %32, %305, %cst_75 {dimension_numbers = #tpu.dot_dimension_numbers<[2], [1], [1], [2], [0, 0, 0, 1, 1, 2], [0], [0]>} : vector<2x8x8xf32>, vector<2x8x32xf32>, vector<2x8x32xf32> -> vector<2x8x32xf32>
    "tpu.trace_stop"() : () -> ()
    %307 = tpu.concatenate %304, %306 in 2 : vector<2x8x32xf32>, vector<2x8x32xf32> -> vector<2x8x64xf32>
    %308 = vector.shape_cast %307 : vector<2x8x64xf32> to vector<16x64xf32>
    %309 = arith.truncf %308 : vector<16x64xf32> to vector<16x64xbf16>
    %c0_76 = arith.constant 0 : index
    %c0_77 = arith.constant 0 : index
    %310 = vector.load %arg8[%c0_76, %c0_77] : memref<64x128xbf16, #tpu.memory_space<vmem>>, vector<64x128xbf16>
    %cst_78 = arith.constant dense<0.000000e+00> : vector<16x128xf32>
    %311 = tpu.matmul %309, %310, %cst_78 {dimension_numbers = #tpu.dot_dimension_numbers<[1], [0], [0], [1], [0, 0, 1, 1], [], []>} : vector<16x64xbf16>, vector<64x128xbf16>, vector<16x128xf32> -> vector<16x128xf32>
    %c0_79 = arith.constant 0 : index
    %c0_80 = arith.constant 0 : index
    %312 = vector.load %arg9[%c0_79, %c0_80] : memref<1x128xf32, #tpu.memory_space<vmem>>, vector<1x128xf32>
    %313 = vector.shape_cast %312 : vector<1x128xf32> to vector<128xf32>
    %314 = vector.shape_cast %313 : vector<128xf32> to vector<1x128xf32>
    %315 = vector.broadcast %314 : vector<1x128xf32> to vector<16x128xf32>
    %316 = arith.addf %311, %315 : vector<16x128xf32>
    %317 = vector.shape_cast %316 : vector<16x128xf32> to vector<2x8x128xf32>
    %318 = vector.broadcast %301 : vector<2x8x1xf32> to vector<2x8x128xf32>
    %319 = arith.mulf %317, %318 : vector<2x8x128xf32>
    %c0_81 = arith.constant 0 : index
    %c0_82 = arith.constant 0 : index
    %c0_83 = arith.constant 0 : index
    %320 = vector.load %arg14[%c0_81, %c0_82, %c0_83] : memref<2x8x1xf32, #tpu.memory_space<vmem>>, vector<2x8x1xf32>
    %321 = vector.broadcast %320 : vector<2x8x1xf32> to vector<2x8x128xf32>
    %322 = arith.addf %319, %321 : vector<2x8x128xf32>
    %c0_84 = arith.constant 0 : index
    %c0_85 = arith.constant 0 : index
    %c0_86 = arith.constant 0 : index
    %323 = vector.load %arg10[%c0_84, %c0_85, %c0_86] : memref<1x8x128xf32, #tpu.memory_space<vmem>>, vector<1x8x128xf32>
    %324 = vector.broadcast %323 : vector<1x8x128xf32> to vector<2x8x128xf32>
    %325 = arith.mulf %322, %324 : vector<2x8x128xf32>
    %c0_87 = arith.constant 0 : index
    %c0_88 = arith.constant 0 : index
    %c0_89 = arith.constant 0 : index
    %326 = vector.load %arg11[%c0_87, %c0_88, %c0_89] : memref<1x8x128xf32, #tpu.memory_space<vmem>>, vector<1x8x128xf32>
    %327 = vector.broadcast %326 : vector<1x8x128xf32> to vector<2x8x128xf32>
    %328 = arith.addf %325, %327 : vector<2x8x128xf32>
    %c0_90 = arith.constant 0 : index
    %c0_91 = arith.constant 0 : index
    %c0_92 = arith.constant 0 : index
    %329 = vector.load %arg15[%c0_90, %c0_91, %c0_92] : memref<2x8x128xf32, #tpu.memory_space<vmem>>, vector<2x8x128xf32>
    tpu.vector_store %arg15[%c0_90, %c0_91, %c0_92], %328 {strides = array<i32>} : memref<2x8x128xf32, #tpu.memory_space<vmem>>, vector<2x8x128xf32>,
    return
  }
}

</mosaic_0001>

<bundles_post_ra>
// kernel: _ner_forward_jit.1
= control target key start
LH: loop header
LB: loop body
LE: loop exit
PB: predicated region body
PF: predicated region fallthrough
CT: control target
= control target key end

     0   :  { %vm74_vm0 = vcmask 1043456   ;;  %vm70_vm1 = vcmask 195584   ;;  %s2291_s21 = smov 16   ;;  %vm243_vm2 = vcmask 130048   ;;  %vm248_vm3 = vcmask 64512   ;;  %s2849_s2 = inlined_call_operand.vmem [shape: bf16[24,8], index: 2, kind: input, shape index: {}]   ;;  %s2850_s1 = inlined_call_operand.vmem [shape: bf16[6,16,24], index: 1, kind: input, shape index: {}]   ;;  %s2851_s3 = inlined_call_operand.vmem [shape: f32[1,8], index: 3, kind: input, shape index: {}]   ;;  %s2852_s4 = inlined_call_operand.vmem [shape: bf16[24,256], index: 4, kind: input, shape index: {}]   ;;  %s2853_s0 = inlined_call_operand.vmem [shape: f32[2,8,16], index: 0, kind: input, shape index: {}]   ;;  %s2854_s12 = inlined_call_operand.vmem [shape: f32[2,8,8], index: 12, kind: input, shape index: {}]   ;;  %s2855_s5 = inlined_call_operand.vmem [shape: bf16[24,256], index: 5, kind: input, shape index: {}]   ;;  %s2856_s6 = inlined_call_operand.vmem [shape: bf16[64,256], index: 6, kind: input, shape index: {}]   ;;  %s2857_s7 = inlined_call_operand.vmem [shape: f32[1,256], index: 7, kind: input, shape index: {}]   ;;  %s2858_s13 = inlined_call_operand.vmem [shape: f32[2,8,1], index: 13, kind: input, shape index: {}]   ;;  %s2859_s14 = inlined_call_operand.vmem [shape: f32[2,8,1], index: 14, kind: input, shape index: {}]   ;;  %s2860_s8 = inlined_call_operand.vmem [shape: bf16[64,128], index: 8, kind: input, shape index: {}]   ;;  %s2861_s9 = inlined_call_operand.vmem [shape: f32[1,128], index: 9, kind: input, shape index: {}]   ;;  %s2862_s10 = inlined_call_operand.vmem [shape: f32[1,8,128], index: 10, kind: input, shape index: {}]   ;;  %s2863_s11 = inlined_call_operand.vmem [shape: f32[1,8,128], index: 11, kind: input, shape index: {}]   ;;  %s2864_s15 = inlined_call_operand.vmem [shape: f32[2,8,128], index: 15, kind: output, shape index: {}]  }
   0x1   :  { %v53_v0 = vld [vmem:[%s2849_s2 + $0x8] sm:$0xf]  ;;  %v2045_v4 = vld [vmem:[%s2849_s2] sm:$0xff]  ;;  %v2048_v7 = vld [vmem:[%s2850_s1 + $0x10] sm:$0xff] }
   0x2   :  { %v66_v1 = vunpack.c.l.b16 %v53_v0  ;;  %v2046_v5 = vld [vmem:[%s2850_s1] sm:$0xff]  ;;  %v2047_v6 = vld [vmem:[%s2850_s1 + $0x8] sm:$0xff]  ;;  %v2049_v8 = vld [vmem:[%s2850_s1 + $0x18] sm:$0xff] }
   0x3   :  { %v2050_v9 = vld [vmem:[%s2850_s1 + $0x20] sm:$0xff]  ;;  %v2051_v10 = vld [vmem:[%s2850_s1 + $0x28] sm:$0xff]  ;;  %v299_v13 = vld [vmem:[%s2852_s4 + $0x10] sm:$0xff] }
   0x4   :  { %v68_v2 = vpack.c.b16 %v66_v1, %v66_v1  ;;  %v362_v14 = vunpack.c.l.b16 %v299_v13  ;;  %v363_v15 = vunpack.c.h.b16 %v299_v13  ;;  %v2095_v37 = vld [vmem:[%s2851_s3] ss:$0 sm:$0xff]  ;;  %v2053_v45 = vld [vmem:[%s2852_s4 + $0x4] sm:$0xf0]  ;;  %v2052_v46 = vld [vmem:[%s2852_s4 + $0x4] sm:$0xf] }
   0x5   :  { %v1940_v44 = vld [vmem:[%s2852_s4] sm:$0xf]  ;;  %v1942_v48 = vld [vmem:[%s2852_s4 + $0x8] sm:$0xf0]  ;;  %v302_v60 = vld [vmem:[%s2855_s5 + $0x10] sm:$0xff] }
   0x6   :  { %v76_v3 = vsel %vm74_vm0, %v68_v2, 0  ;;  %v366_v16 = vpack.c.b16 %v362_v14, %v362_v14  ;;  %v367_v17 = vpack.c.b16 %v363_v15, %v363_v15  ;;  %v1941_v47 = vor.u32 %v2053_v45, %v1940_v44  ;;  %v233_v51 = vld [vmem:[%s2853_s0] sm:$0xff]  ;;  %v234_v52 = vld [vmem:[%s2853_s0 + $0x8] sm:$0xff]  ;;  %v1976_v13 = vld [vmem:[%s2856_s6 + $0x38] sm:$0xf0] }
   0x7   :  { %84 = vmatpush.bf16.msra.mxu0 %v76_v3  ;;  %109 = vmatpush.bf16.msra.mxu1 %v76_v3  ;;  %v1945_v49 = vor.u32 %v2052_v46, %v1942_v48  ;;  %v246_v55 = vld [vmem:[%s2854_s12] sm:$0xff]  ;;  %v247_v56 = vld [vmem:[%s2854_s12 + $0x8] sm:$0xff]  ;;  %v310_v61 = vunpack.c.l.b16 %v302_v60  ;;  %v311_v62 = vunpack.c.h.b16 %v302_v60 }
   0x8   :  { %136 = vmatpush.bf16.msra.mxu2 %v76_v3  ;;  %163 = vmatpush.bf16.msra.mxu3 %v76_v3  ;;  %v374_v18 = vsel %vm74_vm0, %v366_v16, 0  ;;  %v377_v19 = vsel %vm74_vm0, %v367_v17, 0  ;;  %v1966_v14 = vld [vmem:[%s2856_s6 + $0x20] sm:$0xf]  ;;  %v2061_v15 = vld [vmem:[%s2856_s6 + $0x24] sm:$0xf0] }
   0x9   :  { %v314_v63 = vpack.c.b16 %v310_v61, %v310_v61  ;;  %v315_v0 = vpack.c.b16 %v311_v62, %v311_v62  ;;  %v2060_v17 = vld [vmem:[%s2856_s6 + $0x24] sm:$0xf] }
   0xb   :  { %85 = vmatpush.bf16.msra.mxu0 %v2045_v4  ;;  %110 = vmatpush.bf16.msra.mxu1 %v2045_v4  ;;  %v322_v1 = vsel %vm74_vm0, %v314_v63, 0  ;;  %v325_v2 = vsel %vm74_vm0, %v315_v0, 0 }
   0xc   :  { %137 = vmatpush.bf16.msra.mxu2 %v2045_v4  ;;  %164 = vmatpush.bf16.msra.mxu3 %v2045_v4 }
   0xe   :  { %1890 = vmatmul.msk.bf16.vlgmr.msra.gmra.mxu0 %vm70_vm1, %v2046_v5  ;;  %1897 = vmatmul.msk.bf16.vlgmr.msra.gmra.mxu1 %vm70_vm1, %v2047_v6  ;;  %v2054_v5 = vld [vmem:[%s2855_s5 + $0x4] sm:$0xf] }
   0xf   :  { %190 = vmatpush.bf16.msrb.mxu0 %v76_v3  ;;  %217 = vmatpush.bf16.msrb.mxu1 %v76_v3  ;;  %v1930_v3 = vld [vmem:[%s2855_s5] sm:$0xf] }
  0x10   :  { %1904 = vmatmul.msk.bf16.vlgmr.msra.gmra.mxu2 %vm70_vm1, %v2048_v7  ;;  %1911 = vmatmul.msk.bf16.vlgmr.msra.gmra.mxu3 %vm70_vm1, %v2049_v8  ;;  %v1932_v7 = vld [vmem:[%s2855_s5 + $0x8] sm:$0xf0] }
  0x11   :  { %v1935_v8 = vor.u32 %v2054_v5, %v1932_v7 }
  0x13   :  { %191 = vmatpush.bf16.msrb.mxu0 %v2045_v4  ;;  %218 = vmatpush.bf16.msrb.mxu1 %v2045_v4  ;;  %v2055_v4 = vld [vmem:[%s2855_s5 + $0x4] sm:$0xf0] }
  0x14   :  { %v1931_v6 = vor.u32 %v2055_v4, %v1930_v3 }
  0x17   :  { %385 = vmatpush.bf16.msra.mxu0 %v374_v18  ;;  %399 = vmatpush.bf16.msra.mxu1 %v377_v19  ;;  %v1968_v18 = vld [vmem:[%s2856_s6 + $0x28] sm:$0xf0]  ;;  %v2488_v19 = vor.u32 %v2061_v15, %v1966_v14 }
  0x1b   :  { %386 = vmatpush.bf16.msra.mxu0 %v1941_v47  ;;  %400 = vmatpush.bf16.msra.mxu1 %v1945_v49 }
  0x1e   :  { %1918 = vmatmul.msk.bf16.vlgmr.msrb.gmra.mxu0 %vm70_vm1, %v2050_v9  ;;  %1925 = vmatmul.msk.bf16.vlgmr.msrb.gmra.mxu1 %vm70_vm1, %v2051_v10  ;;  %v1974_v9 = vld [vmem:[%s2856_s6 + $0x30] sm:$0xf]  ;;  %v2063_v10 = vld [vmem:[%s2856_s6 + $0x34] sm:$0xf0] }
  0x8b   :  { %v87_v11 = vpop.f32.mrf.mxu0  ;;  %v112_v12 = vpop.f32.mrf.mxu1 }
  0x8c   :  { %v117_v24 = vmax.f32 %v87_v11, %v112_v12  ;;  %v2062_v11 = vld [vmem:[%s2856_s6 + $0x34] sm:$0xf]  ;;  %v2468_v12 = vor.u32 %v2063_v10, %v1974_v9 }
  0x8d   :  { %v2479_v16 = vor.u32 %v2062_v11, %v1976_v13 }
  0x8e   :  { %622 = vmatpush.bf16.msrb.mxu0 %v2468_v12 }
  0x8f   :  { %635 = vmatpush.bf16.msrb.mxu1 %v2479_v16 }
  0x92   :  { %623 = vmatpush.bf16.msrb.mxu0 %v2488_v19 }
  0x93   :  { %v139_v20 = vpop.f32.mrf.mxu2  ;;  %v89_v21 = vpop.f32.mrf.mxu0 }
  0x94   :  { %v114_v22 = vpop.f32.mrf.mxu1  ;;  %v166_v23 = vpop.f32.mrf.mxu3  ;;  %v144_v25 = vmax.f32 %v117_v24, %v139_v20  ;;  %v2492_v20 = vor.u32 %v2060_v17, %v1968_v18  ;;  %v1960_v24 = vld [vmem:[%s2856_s6 + $0x18] sm:$0xf0] }
  0x95   :  { %v118_v29 = vmax.f32 %v89_v21, %v114_v22  ;;  %v1958_v21 = vld [vmem:[%s2856_s6 + $0x10] sm:$0xf]  ;;  %v2059_v22 = vld [vmem:[%s2856_s6 + $0x14] sm:$0xf0] }
  0x96   :  { %v171_v30 = vmax.f32 %v144_v25, %v166_v23  ;;  %v2058_v23 = vld [vmem:[%s2856_s6 + $0x14] sm:$0xf]  ;;  %v2292_v25 = vmov 0   ;;  %636 = vmatpush.bf16.msrb.mxu1 %v2492_v20 }
  0x97   :  { %2083 = vset.pattern.permute.xlu2 %v2292_v25  ;;  %2082 = vset.pattern.permute.xlu1 %v2292_v25 }
  0x98   :  { %2094 = vset.pattern.permute.xlu0 %v2292_v25 }
  0x9b   :  { %v141_v26 = vpop.f32.mrf.mxu2  ;;  %v193_v27 = vpop.f32.mrf.mxu0 }
  0x9c   :  { %v220_v28 = vpop.f32.mrf.mxu1  ;;  %v145_v31 = vmax.f32 %v118_v29, %v141_v26  ;;  %v198_v32 = vmax.f32 %v171_v30, %v193_v27  ;;  %v168_v33 = vpop.f32.mrf.mxu3  ;;  %v2508_v26 = vor.u32 %v2059_v22, %v1958_v21  ;;  %v2512_v27 = vor.u32 %v2058_v23, %v1960_v24  ;;  %v2057_v29 = vld [vmem:[%s2856_s6 + $0x4] sm:$0xf0]  ;;  %v2056_v30 = vld [vmem:[%s2856_s6 + $0x4] sm:$0xf] }
  0x9e   :  { %v172_v34 = vmax.f32 %v145_v31, %v168_v33  ;;  %v225_v36 = vmax.f32 %v198_v32, %v220_v28  ;;  %v1950_v28 = vld [vmem:[%s2856_s6] sm:$0xf]  ;;  %v1952_v31 = vld [vmem:[%s2856_s6 + $0x8] sm:$0xf0]  ;;  %624 = vmatpush.bf16.msrb.mxu0 %v2508_v26  ;;  %637 = vmatpush.bf16.msrb.mxu1 %v2512_v27 }
  0x9f   :  { %v2528_v32 = vor.u32 %v2057_v29, %v1950_v28  ;;  %v2532_v33 = vor.u32 %v2056_v30, %v1952_v31 }
  0xa0   :  { %v231_v41 = vadd.f32 %v2095_v37, %v225_v36 }
  0xa2   :  { %625 = vmatpush.bf16.msrb.mxu0 %v2528_v32  ;;  %638 = vmatpush.bf16.msrb.mxu1 %v2532_v33 }
  0xa3   :  { %v195_v35 = vpop.f32.mrf.mxu0 }
  0xa4   :  { %v199_v38 = vmax.f32 %v172_v34, %v195_v35  ;;  %v222_v39 = vpop.f32.mrf.mxu1 }
  0xa6   :  { %v226_v40 = vmax.f32 %v199_v38, %v222_v39 }
  0xa8   :  { %v232_v42 = vadd.f32 %v2095_v37, %v226_v40  ;;  %v407_v40 = vld [vmem:[%s2857_s7] sm:$0x3]  ;;  %s2293_s7 = smov 64  }
  0xa9   :  { %v409_v44 = vperm.slane %v407_v40, 0  ;;  %v410_v63 = vperm.slane %v407_v40, 1 }
  0xaa   :  { %v2072_v43 = vpack.i.bf16 %v232_v42, %v231_v41 }
  0xac   :  { %2073 = vrot.lane.b32.xlu0 %v2072_v43, %s2291_s21 }
 0x11e   :  { %v2074_v50 = vpop.permute.xlu0 %2073 }
 0x11f   :  { %v2076_v53 = vunpack.i.h.bf16 %v2074_v50  ;;  %v2075_v54 = vunpack.i.l.bf16 %v2074_v50 }
 0x121   :  { %v244_v57 = vsel %vm243_vm2, %v233_v51, %v2075_v54  ;;  %v245_v58 = vsel %vm243_vm2, %v234_v52, %v2076_v53 }
 0x122   :  { %267 = vmatpush.msrb.mxu2 %v244_v57  ;;  %290 = vmatpush.msrb.mxu3 %v245_v58  ;;  %v295_v59 = vpack.c.bf16 %v245_v58, %v244_v57 }
 0x123   :  { %1926 = vmatmul.msk.f32.vlgmr.msrb.gmra.mxu2 %vm248_vm3, %v246_v55  ;;  %1927 = vmatmul.msk.f32.vlgmr.msrb.gmra.mxu3 %vm248_vm3, %v247_v56 }
 0x124   :  { %1946 = vmatmul.msk.bf16.vlgmr.msra.gmra.mxu0 %vm70_vm1, %v295_v59  ;;  %1947 = vmatmul.msk.bf16.vlgmr.msra.gmra.mxu1 %vm70_vm1, %v295_v59 }
 0x125   :  { %333 = vmatpush.bf16.msra.mxu2 %v322_v1  ;;  %347 = vmatpush.bf16.msra.mxu3 %v325_v2 }
 0x126   :  { %933 = vmatpush.bf16.msra.mxu0 %v2468_v12  ;;  %946 = vmatpush.bf16.msra.mxu1 %v2479_v16 }
 0x129   :  { %334 = vmatpush.bf16.msra.mxu2 %v1931_v6  ;;  %348 = vmatpush.bf16.msra.mxu3 %v1935_v8 }
 0x12a   :  { %934 = vmatpush.bf16.msra.mxu0 %v2488_v19  ;;  %947 = vmatpush.bf16.msra.mxu1 %v2492_v20 }
 0x12d   :  { %473 = vmatpush.bf16.msrb.mxu2 %v2468_v12  ;;  %486 = vmatpush.bf16.msrb.mxu3 %v2479_v16 }
 0x12e   :  { %935 = vmatpush.bf16.msra.mxu0 %v2508_v26  ;;  %948 = vmatpush.bf16.msra.mxu1 %v2512_v27 }
 0x131   :  { %474 = vmatpush.bf16.msrb.mxu2 %v2488_v19  ;;  %487 = vmatpush.bf16.msrb.mxu3 %v2492_v20 }
 0x132   :  { %936 = vmatpush.bf16.msra.mxu0 %v2528_v32  ;;  %949 = vmatpush.bf16.msra.mxu1 %v2532_v33 }
 0x135   :  { %475 = vmatpush.bf16.msrb.mxu2 %v2508_v26  ;;  %488 = vmatpush.bf16.msrb.mxu3 %v2512_v27 }
 0x139   :  { %476 = vmatpush.bf16.msrb.mxu2 %v2528_v32  ;;  %489 = vmatpush.bf16.msrb.mxu3 %v2532_v33 }
 0x1a1   :  { %v388_v39 = vpop.f32.mrf.mxu0  ;;  %v402_v55 = vpop.f32.mrf.mxu1 }
 0x1a6   :  { %v269_v34 = vpop.f32.mrf.mxu2  ;;  %v292_v35 = vpop.f32.mrf.mxu3 }
 0x1a7   :  { %v296_v36 = vpack.c.bf16 %v292_v35, %v269_v34 }
 0x1a9   :  { %1936 = vmatmul.msk.bf16.vlgmr.msra.gmra.mxu2 %vm70_vm1, %v296_v36  ;;  %1937 = vmatmul.msk.bf16.vlgmr.msra.gmra.mxu3 %vm70_vm1, %v296_v36  ;;  %v390_v45 = vpop.f32.mrf.mxu0  ;;  %v404_v1 = vpop.f32.mrf.mxu1 }
 0x1aa   :  { %776 = vmatpush.bf16.msra.mxu2 %v2468_v12  ;;  %789 = vmatpush.bf16.msra.mxu3 %v2479_v16 }
 0x1ae   :  { %777 = vmatpush.bf16.msra.mxu2 %v2488_v19  ;;  %790 = vmatpush.bf16.msra.mxu3 %v2492_v20 }
 0x1b2   :  { %778 = vmatpush.bf16.msra.mxu2 %v2508_v26  ;;  %791 = vmatpush.bf16.msra.mxu3 %v2512_v27 }
 0x1b6   :  { %779 = vmatpush.bf16.msra.mxu2 %v2528_v32  ;;  %792 = vmatpush.bf16.msra.mxu3 %v2532_v33 }
 0x1b9   :  { %477 = vmatmul.bf16.vlgmr.msrb.gmra.mxu2 %v2292_v25  ;;  %490 = vmatmul.bf16.vlgmr.msrb.gmra.mxu3 %v2292_v25 }
 0x1ba   :  { %1090 = vmatpush.bf16.msrb.mxu2 %v2468_v12  ;;  %1103 = vmatpush.bf16.msrb.mxu3 %v2479_v16 }
 0x1be   :  { %1091 = vmatpush.bf16.msrb.mxu2 %v2488_v19  ;;  %1104 = vmatpush.bf16.msrb.mxu3 %v2492_v20 }
 0x1c2   :  { %1092 = vmatpush.bf16.msrb.mxu2 %v2508_v26  ;;  %1105 = vmatpush.bf16.msrb.mxu3 %v2512_v27 }
 0x1c6   :  { %1093 = vmatpush.bf16.msrb.mxu2 %v2528_v32  ;;  %1106 = vmatpush.bf16.msrb.mxu3 %v2532_v33 }
 0x22c   :  { %v336_v37 = vpop.f32.mrf.mxu2  ;;  %v350_v38 = vpop.f32.mrf.mxu3 }
 0x22d   :  { %v389_v43 = vadd.f32 %v388_v39, %v336_v37  ;;  %v403_v62 = vadd.f32 %v402_v55, %v350_v38 }
 0x22f   :  { %v2568_v47 = vadd.f32 %v409_v44, %v389_v43  ;;  %v2574_v3 = vadd.f32 %v410_v63, %v403_v62 }
 0x234   :  { %v338_v41 = vpop.f32.mrf.mxu2  ;;  %v352_v42 = vpop.f32.mrf.mxu3 }
 0x235   :  { %v391_v46 = vadd.f32 %v390_v45, %v338_v41  ;;  %v405_v2 = vadd.f32 %v404_v1, %v352_v42 }
 0x237   :  { %v2570_v50 = vadd.f32 %v409_v44, %v391_v46  ;;  %v2576_v6 = vadd.f32 %v410_v63, %v405_v2 }
 0x23c   :  { %v478_v48 = vpop.f32.mrf.mxu2  ;;  %v491_v49 = vpop.f32.mrf.mxu3 }
 0x23d   :  { %v497_v51 = vrot.slane %v478_v48, 1  ;;  %v503_v52 = vadd.f32 %v478_v48, %v2568_v47  ;;  %v498_v4 = vrot.slane %v491_v49, 1  ;;  %v504_v7 = vadd.f32 %v491_v49, %v2574_v3 }
 0x23f   :  { %v505_v53 = vadd.f32 %v497_v51, %v2570_v50  ;;  %v1980_v54 = vmul.f32 -1.442695, %v503_v52  ;;  %v506_v10 = vadd.f32 %v498_v4, %v2576_v6  ;;  %v1982_v40 = vmul.f32 -1.442695, %v504_v7 }
 0x241   :  { %2097 = vpow2.f32 %v1980_v54  ;;  %v1981_v56 = vmul.f32 -1.442695, %v505_v53  ;;  %v1983_v41 = vmul.f32 -1.442695, %v506_v10 }
 0x243   :  { %2099 = vpow2.f32 %v1981_v56 }
 0x244   :  { %v480_v57 = vpop.f32.mrf.mxu2  ;;  %v493_v58 = vpop.f32.mrf.mxu3 }
 0x247   :  { %v2098_v59 = vpop.eup %2097 }
 0x248   :  { %v513_v60 = vadd.f32 1.0, %v2098_v59 }
 0x249   :  { %v2100_v61 = vpop.eup %2099 }
 0x24a   :  { %v514_v0 = vadd.f32 1.0, %v2100_v61  ;;  %2101 = vrcp.f32 %v513_v60  ;;  %v526_v14 = vand.u32 2147483648, %v513_v60  ;;  %v524_v17 = vand.u32 2147483647, %v513_v60 }
 0x24b   :  { %vm520_vm5 = vweird.f32 %v513_v60 }
 0x24c   :  { %2103 = vrcp.f32 %v514_v0  ;;  %v541_v21 = vand.u32 2147483648, %v514_v0  ;;  %v539_v24 = vand.u32 2147483647, %v514_v0  ;;  %v527_v25 = vor.u32 1.1754944e-38, %v526_v14 }
 0x24d   :  { %2105 = vtanh.f32 %v504_v7  ;;  %vm525_vm8 = vcmp.eq.f32.partialorder %v524_v17, 8.507059e+37  ;;  %vm535_vm9 = vweird.f32 %v514_v0 }
 0x24e   :  { %2107 = vtanh.f32 %v506_v10  ;;  %v542_v34 = vor.u32 1.1754944e-38, %v541_v21  ;;  %vm540_vm11 = vcmp.eq.f32.partialorder %v539_v24, 8.507059e+37 }
 0x24f   :  { %2109 = vpow2.f32 %v1982_v40 }
 0x250   :  { %v2102_v5 = vpop.eup %2101  ;;  %2111 = vpow2.f32 %v1983_v41 }
 0x251   :  { %v516_v8 = vmul.f32 %v2102_v5, %v513_v60  ;;  %vm521_vm4 = vweird.f32 %v2102_v5 }
 0x252   :  { %v2104_v9 = vpop.eup %2103  ;;  %vm522_vm7 = vmor %vm520_vm5, %vm521_vm4 }
 0x253   :  { %v517_v11 = vsub.f32 1.0, %v516_v8  ;;  %v531_v13 = vmul.f32 %v2104_v9, %v514_v0  ;;  %vm536_vm6 = vweird.f32 %v2104_v9  ;;  %v2106_v30 = vpop.eup %2105 }
 0x254   :  { %vm537_vm10 = vmor %vm535_vm9, %vm536_vm6  ;;  %v2108_v37 = vpop.eup %2107  ;;  %vm610_vm6 = vcmask 1041409  }
 0x255   :  { %v518_v15 = vmul.f32 %v2102_v5, %v517_v11  ;;  %v532_v18 = vsub.f32 1.0, %v531_v13  ;;  %v2110_v42 = vpop.eup %2109 }
 0x256   :  { %v2112_v43 = vpop.eup %2111  ;;  %v553_v44 = vadd.f32 1.0, %v2110_v42 }
 0x257   :  { %v519_v22 = vadd.f32 %v2102_v5, %v518_v15  ;;  %v533_v23 = vmul.f32 %v2104_v9, %v532_v18  ;;  %v554_v45 = vadd.f32 1.0, %v2112_v43 }
 0x258   :  { %2113 = vrcp.f32 %v553_v44  ;;  %v566_v62 = vand.u32 2147483648, %v553_v44  ;;  %vm560_vm13 = vweird.f32 %v553_v44  ;;  %v564_v0 = vand.u32 2147483647, %v553_v44 }
 0x259   :  { %v523_v28 = vsel %vm522_vm7, %v2102_v5, %v519_v22  ;;  %v534_v29 = vadd.f32 %v2104_v9, %v533_v23  ;;  %2115 = vrcp.f32 %v554_v45  ;;  %v581_v2 = vand.u32 2147483648, %v554_v45 }
 0x25a   :  { %v528_v31 = vsel %vm525_vm8, %v527_v25, %v523_v28  ;;  %vm575_vm1 = vweird.f32 %v554_v45  ;;  %v579_v5 = vand.u32 2147483647, %v554_v45  ;;  %v567_v7 = vor.u32 1.1754944e-38, %v566_v62 }
 0x25b   :  { %v587_v35 = vmul.f32 %v2106_v30, %v528_v31  ;;  %v538_v36 = vsel %vm537_vm10, %v2104_v9, %v534_v29  ;;  %v585_v55 = vmul.f32 0.0, %v528_v31  ;;  %vm565_vm4 = vcmp.eq.f32.partialorder %v564_v0, 8.507059e+37 }
 0x25c   :  { %v543_v38 = vsel %vm540_vm11, %v542_v34, %v538_v36  ;;  %v582_v11 = vor.u32 1.1754944e-38, %v581_v2  ;;  %vm580_vm5 = vcmp.eq.f32.partialorder %v579_v5, 8.507059e+37  ;;  %vm465_vm7 = vcmask 523264  }
 0x25d   :  { %591 = vrot.lane.b32.xlu1 %v587_v35, %s2293_s7  ;;  %v588_v39 = vmul.f32 %v2108_v37, %v543_v38  ;;  %v586_v59 = vmul.f32 0.0, %v543_v38 }
 0x25e   :  { %v2114_v46 = vpop.eup %2113 }
 0x25f   :  { %593 = vrot.lane.b32.xlu0 %v588_v39, %s2293_s7  ;;  %v2116_v48 = vpop.eup %2115  ;;  %v556_v49 = vmul.f32 %v2114_v46, %v553_v44  ;;  %vm561_vm12 = vweird.f32 %v2114_v46 }
 0x260   :  { %v571_v51 = vmul.f32 %v2116_v48, %v554_v45  ;;  %vm576_vm14 = vweird.f32 %v2116_v48  ;;  %vm562_vm15 = vmor %vm560_vm13, %vm561_vm12 }
 0x261   :  { %v557_v52 = vsub.f32 1.0, %v556_v49  ;;  %vm577_vm2 = vmor %vm575_vm1, %vm576_vm14 }
 0x262   :  { %v572_v53 = vsub.f32 1.0, %v571_v51 }
 0x263   :  { %v558_v54 = vmul.f32 %v2114_v46, %v557_v52 }
 0x264   :  { %v573_v57 = vmul.f32 %v2116_v48, %v572_v53 }
 0x265   :  { %v559_v60 = vadd.f32 %v2114_v46, %v558_v54 }
 0x266   :  { %v574_v1 = vadd.f32 %v2116_v48, %v573_v57 }
 0x267   :  { %v563_v4 = vsel %vm562_vm15, %v2114_v46, %v559_v60 }
 0x268   :  { %v578_v8 = vsel %vm577_vm2, %v2116_v48, %v574_v1  ;;  %v568_v10 = vsel %vm565_vm4, %v567_v7, %v563_v4 }
 0x269   :  { %v583_v15 = vsel %vm580_vm5, %v582_v11, %v578_v8 }
 0x2cf   :  { %v592_v56 = vpop.permute.xlu1 %591 }
 0x2d0   :  { %v2582_v58 = vadd.f32 %v592_v56, %v585_v55 }
 0x2d1   :  { %v594_v61 = vpop.permute.xlu0 %593 }
 0x2d2   :  { %2117 = vtanh.f32 %v2582_v58  ;;  %v2585_v63 = vadd.f32 %v594_v61, %v586_v59 }
 0x2d4   :  { %2119 = vtanh.f32 %v2585_v63  ;;  %v737_v0 = vrot.slane %v2585_v63, 7 }
 0x2d8   :  { %v2118_v9 = vpop.eup %2117 }
 0x2d9   :  { %v2588_v13 = vmul.f32 %v2118_v9, %v568_v10  ;;  %v736_v9 = vrot.slane %v2582_v58, 7 }
 0x2da   :  { %v2120_v14 = vpop.eup %2119 }
 0x2db   :  { %v2590_v17 = vmul.f32 %v2120_v14, %v583_v15  ;;  %v603_v18 = vpack.c.bf16 %v2588_v13, %v2588_v13 }
 0x2dd   :  { %v604_v21 = vpack.c.bf16 %v2590_v17, %v2590_v17  ;;  %v607_v23 = vunpack.c.l.b16 %v603_v18 }
 0x2df   :  { %v608_v22 = vunpack.c.l.b16 %v604_v21 }
 0x2e1   :  { %v609_v24 = vrot.slane %v608_v22, 7 }
 0x2e3   :  { %v611_v25 = vsel %vm610_vm6, %v609_v24, %v607_v23 }
 0x2e4   :  { %v612_v28 = vpack.c.b16 %v611_v25, %v611_v25 }
 0x2e6   :  { %613 = vrot.lane.b32.xlu1 %v612_v28, %s2293_s7 }
 0x358   :  { %v614_v29 = vpop.permute.xlu1 %613 }
 0x359   :  { %1984 = vmatmul.msk.bf16.vlgmr.msrb.gmra.mxu0 %vm465_vm7, %v614_v29  ;;  %1985 = vmatmul.msk.bf16.vlgmr.msrb.gmra.mxu1 %vm465_vm7, %v614_v29 }
 0x35a   :  { %1247 = vmatpush.bf16.msrb.mxu0 %v2468_v12  ;;  %1260 = vmatpush.bf16.msrb.mxu1 %v2479_v16 }
 0x35e   :  { %1248 = vmatpush.bf16.msrb.mxu0 %v2488_v19  ;;  %1261 = vmatpush.bf16.msrb.mxu1 %v2492_v20 }
 0x362   :  { %1249 = vmatpush.bf16.msrb.mxu0 %v2508_v26  ;;  %1262 = vmatpush.bf16.msrb.mxu1 %v2512_v27 }
 0x366   :  { %1250 = vmatpush.bf16.msrb.mxu0 %v2528_v32  ;;  %1263 = vmatpush.bf16.msrb.mxu1 %v2532_v33 }
 0x3d6   :  { %v627_v30 = vpop.f32.mrf.mxu0  ;;  %v640_v31 = vpop.f32.mrf.mxu1 }
 0x3d7   :  { %v646_v34 = vrot.slane %v627_v30, 7  ;;  %v654_v35 = vadd.f32 %v627_v30, %v2570_v50  ;;  %v647_v45 = vrot.slane %v640_v31, 7  ;;  %v655_v5 = vadd.f32 %v640_v31, %v2576_v6 }
 0x3d9   :  { %v652_v36 = vadd.f32 %v646_v34, %v2568_v47  ;;  %v1987_v37 = vmul.f32 -1.442695, %v654_v35  ;;  %v653_v51 = vadd.f32 %v647_v45, %v2574_v3  ;;  %v1989_v24 = vmul.f32 -1.442695, %v655_v5 }
 0x3db   :  { %v1986_v38 = vmul.f32 -1.442695, %v652_v36  ;;  %2121 = vpow2.f32 %v1987_v37  ;;  %v1988_v23 = vmul.f32 -1.442695, %v653_v51 }
 0x3dd   :  { %2123 = vpow2.f32 %v1986_v38 }
 0x3de   :  { %v629_v39 = vpop.f32.mrf.mxu0  ;;  %v642_v40 = vpop.f32.mrf.mxu1 }
 0x3e1   :  { %v2122_v41 = vpop.eup %2121 }
 0x3e2   :  { %v663_v42 = vadd.f32 1.0, %v2122_v41 }
 0x3e3   :  { %v2124_v43 = vpop.eup %2123 }
 0x3e4   :  { %v662_v44 = vadd.f32 1.0, %v2124_v43  ;;  %2125 = vrcp.f32 %v663_v42  ;;  %v690_v54 = vand.u32 2147483648, %v663_v42  ;;  %v688_v57 = vand.u32 2147483647, %v663_v42 }
 0x3e5   :  { %vm684_vm9 = vweird.f32 %v663_v42 }
 0x3e6   :  { %2127 = vrcp.f32 %v662_v44  ;;  %v675_v59 = vand.u32 2147483648, %v662_v44  ;;  %v673_v61 = vand.u32 2147483647, %v662_v44  ;;  %v691_v1 = vor.u32 1.1754944e-38, %v690_v54 }
 0x3e7   :  { %2129 = vtanh.f32 %v653_v51  ;;  %vm669_vm12 = vweird.f32 %v662_v44  ;;  %vm689_vm13 = vcmp.eq.f32.partialorder %v688_v57, 8.507059e+37 }
 0x3e8   :  { %v676_v7 = vor.u32 1.1754944e-38, %v675_v59  ;;  %vm674_vm15 = vcmp.eq.f32.partialorder %v673_v61, 8.507059e+37  ;;  %2131 = vtanh.f32 %v655_v5 }
 0x3e9   :  { %2133 = vpow2.f32 %v1988_v23 }
 0x3ea   :  { %v2126_v46 = vpop.eup %2125  ;;  %2135 = vpow2.f32 %v1989_v24 }
 0x3eb   :  { %v680_v48 = vmul.f32 %v2126_v46, %v663_v42  ;;  %vm685_vm8 = vweird.f32 %v2126_v46 }
 0x3ec   :  { %v2128_v49 = vpop.eup %2127  ;;  %vm686_vm11 = vmor %vm684_vm9, %vm685_vm8 }
 0x3ed   :  { %v665_v52 = vmul.f32 %v2128_v49, %v662_v44  ;;  %v681_v53 = vsub.f32 1.0, %v680_v48  ;;  %vm670_vm10 = vweird.f32 %v2128_v49  ;;  %v2130_v14 = vpop.eup %2129 }
 0x3ee   :  { %vm671_vm14 = vmor %vm669_vm12, %vm670_vm10  ;;  %v2132_v21 = vpop.eup %2131 }
 0x3ef   :  { %v666_v55 = vsub.f32 1.0, %v665_v52  ;;  %v682_v56 = vmul.f32 %v2126_v46, %v681_v53  ;;  %v2134_v25 = vpop.eup %2133 }
 0x3f0   :  { %v702_v58 = vadd.f32 1.0, %v2134_v25  ;;  %v2136_v28 = vpop.eup %2135 }
 0x3f1   :  { %v667_v60 = vmul.f32 %v2128_v49, %v666_v55  ;;  %v683_v62 = vadd.f32 %v2126_v46, %v682_v56  ;;  %v703_v29 = vadd.f32 1.0, %v2136_v28 }
 0x3f2   :  { %2137 = vrcp.f32 %v702_v58  ;;  %v715_v42 = vand.u32 2147483648, %v702_v58  ;;  %vm709_vm2 = vweird.f32 %v702_v58  ;;  %v713_v43 = vand.u32 2147483647, %v702_v58 }
 0x3f3   :  { %v668_v2 = vadd.f32 %v2128_v49, %v667_v60  ;;  %v687_v4 = vsel %vm686_vm11, %v2126_v46, %v683_v62  ;;  %2139 = vrcp.f32 %v703_v29  ;;  %v730_v55 = vand.u32 2147483648, %v703_v29 }
 0x3f4   :  { %v692_v8 = vsel %vm689_vm13, %v691_v1, %v687_v4  ;;  %v716_v46 = vor.u32 1.1754944e-38, %v715_v42  ;;  %vm714_vm5 = vcmp.eq.f32.partialorder %v713_v43, 8.507059e+37  ;;  %vm724_vm9 = vweird.f32 %v703_v29 }
 0x3f5   :  { %v672_v10 = vsel %vm671_vm14, %v2128_v49, %v668_v2  ;;  %v741_v11 = vmul.f32 %v737_v0, %v692_v8  ;;  %v743_v22 = vmul.f32 %v2132_v21, %v692_v8  ;;  %v728_v56 = vand.u32 2147483647, %v703_v29 }
 0x3f6   :  { %v677_v15 = vsel %vm674_vm15, %v676_v7, %v672_v10  ;;  %v731_v60 = vor.u32 1.1754944e-38, %v730_v55 }
 0x3f7   :  { %v742_v18 = vmul.f32 %v2130_v14, %v677_v15  ;;  %v740_v63 = vmul.f32 %v736_v9, %v677_v15  ;;  %vm729_vm11 = vcmp.eq.f32.partialorder %v728_v56, 8.507059e+37 }
 0x3f8   :  { %v2138_v30 = vpop.eup %2137 }
 0x3f9   :  { %746 = vrot.lane.b32.xlu2 %v742_v18, %s2293_s7  ;;  %v705_v31 = vmul.f32 %v2138_v30, %v702_v58  ;;  %v2140_v35 = vpop.eup %2139  ;;  %vm710_vm1 = vweird.f32 %v2138_v30 }
 0x3fa   :  { %v720_v36 = vmul.f32 %v2140_v35, %v703_v29  ;;  %vm711_vm4 = vmor %vm709_vm2, %vm710_vm1  ;;  %vm725_vm8 = vweird.f32 %v2140_v35 }
 0x3fb   :  { %v706_v34 = vsub.f32 1.0, %v705_v31  ;;  %vm726_vm10 = vmor %vm724_vm9, %vm725_vm8 }
 0x3fc   :  { %v721_v40 = vsub.f32 1.0, %v720_v36 }
 0x3fd   :  { %v707_v37 = vmul.f32 %v2138_v30, %v706_v34 }
 0x3fe   :  { %v722_v45 = vmul.f32 %v2140_v35, %v721_v40 }
 0x3ff   :  { %v708_v41 = vadd.f32 %v2138_v30, %v707_v37 }
 0x400   :  { %v723_v54 = vadd.f32 %v2140_v35, %v722_v45 }
 0x401   :  { %748 = vrot.lane.b32.xlu2 %v743_v22, %s2293_s7  ;;  %v712_v44 = vsel %vm711_vm4, %v2138_v30, %v708_v41 }
 0x402   :  { %v717_v51 = vsel %vm714_vm5, %v716_v46, %v712_v44  ;;  %v727_v57 = vsel %vm726_vm10, %v2140_v35, %v723_v54 }
 0x403   :  { %v732_v62 = vsel %vm729_vm11, %v731_v60, %v727_v57 }
 0x453   :  { %v747_v38 = vpop.permute.xlu2 %746 }
 0x454   :  { %v2616_v39 = vadd.f32 %v747_v38, %v740_v63 }
 0x456   :  { %2141 = vtanh.f32 %v2616_v39  ;;  %v892_v57 = vrot.slane %v2616_v39, 7 }
 0x45b   :  { %v749_v48 = vpop.permute.xlu2 %748 }
 0x45c   :  { %v2142_v49 = vpop.eup %2141  ;;  %v2619_v52 = vadd.f32 %v749_v48, %v741_v11 }
 0x45d   :  { %v2621_v53 = vmul.f32 %v2142_v49, %v717_v51 }
 0x45e   :  { %2143 = vtanh.f32 %v2619_v52 }
 0x45f   :  { %v758_v59 = vpack.c.bf16 %v2621_v53, %v2621_v53 }
 0x461   :  { %v762_v1 = vunpack.c.l.b16 %v758_v59 }
 0x463   :  { %v764_v5 = vrot.slane %v762_v1, 1 }
 0x464   :  { %v2144_v61 = vpop.eup %2143 }
 0x465   :  { %v2626_v0 = vmul.f32 %v2144_v61, %v732_v62  ;;  %v893_v62 = vrot.slane %v2619_v52, 7 }
 0x467   :  { %v759_v2 = vpack.c.bf16 %v2626_v0, %v2626_v0 }
 0x469   :  { %v763_v4 = vunpack.c.l.b16 %v759_v2 }
 0x46b   :  { %v765_v7 = vsel %vm610_vm6, %v763_v4, %v764_v5 }
 0x46c   :  { %v766_v8 = vpack.c.b16 %v765_v7, %v765_v7 }
 0x46e   :  { %767 = vrot.lane.b32.xlu0 %v766_v8, %s2293_s7 }
 0x4e0   :  { %v768_v9 = vpop.permute.xlu0 %767 }
 0x4e1   :  { %1990 = vmatmul.msk.bf16.vlgmr.msra.gmra.mxu2 %vm465_vm7, %v768_v9  ;;  %1991 = vmatmul.msk.bf16.vlgmr.msra.gmra.mxu3 %vm465_vm7, %v768_v9 }
 0x4e2   :  { %1404 = vmatpush.bf16.msra.mxu2 %v2468_v12  ;;  %1417 = vmatpush.bf16.msra.mxu3 %v2479_v16 }
 0x4e6   :  { %1405 = vmatpush.bf16.msra.mxu2 %v2488_v19  ;;  %1418 = vmatpush.bf16.msra.mxu3 %v2492_v20 }
 0x4ea   :  { %1406 = vmatpush.bf16.msra.mxu2 %v2508_v26  ;;  %1419 = vmatpush.bf16.msra.mxu3 %v2512_v27 }
 0x4ee   :  { %1407 = vmatpush.bf16.msra.mxu2 %v2528_v32  ;;  %1420 = vmatpush.bf16.msra.mxu3 %v2532_v33 }
 0x564   :  { %v781_v10 = vpop.f32.mrf.mxu2  ;;  %v794_v11 = vpop.f32.mrf.mxu3 }
 0x565   :  { %v800_v14 = vrot.slane %v781_v10, 6  ;;  %v802_v15 = vrot.slane %v781_v10, 7  ;;  %v801_v30 = vrot.slane %v794_v11, 6  ;;  %v803_v31 = vrot.slane %v794_v11, 7 }
 0x567   :  { %v808_v18 = vadd.f32 %v800_v14, %v2568_v47  ;;  %v810_v63 = vadd.f32 %v802_v15, %v2570_v50  ;;  %v809_v34 = vadd.f32 %v801_v30, %v2574_v3  ;;  %v811_v36 = vadd.f32 %v803_v31, %v2576_v6 }
 0x569   :  { %v1992_v21 = vmul.f32 -1.442695, %v808_v18  ;;  %v1993_v22 = vmul.f32 -1.442695, %v810_v63  ;;  %v1995_v39 = vmul.f32 -1.442695, %v811_v36 }
 0x56a   :  { %v1994_v15 = vmul.f32 -1.442695, %v809_v34 }
 0x56b   :  { %2145 = vpow2.f32 %v1992_v21 }
 0x56c   :  { %2147 = vpow2.f32 %v1993_v22  ;;  %v783_v23 = vpop.f32.mrf.mxu2  ;;  %v796_v24 = vpop.f32.mrf.mxu3 }
 0x571   :  { %v2146_v25 = vpop.eup %2145 }
 0x572   :  { %v2148_v58 = vpop.eup %2147  ;;  %v818_v28 = vadd.f32 1.0, %v2146_v25 }
 0x573   :  { %v819_v29 = vadd.f32 1.0, %v2148_v58 }
 0x574   :  { %2149 = vrcp.f32 %v818_v28  ;;  %v831_v43 = vand.u32 2147483648, %v818_v28  ;;  %v829_v46 = vand.u32 2147483647, %v818_v28  ;;  %vm825_vm14 = vweird.f32 %v818_v28 }
 0x575   :  { %2151 = vrcp.f32 %v819_v29  ;;  %v846_v44 = vand.u32 2147483648, %v819_v29  ;;  %v844_v49 = vand.u32 2147483647, %v819_v29  ;;  %vm840_vm15 = vweird.f32 %v819_v29 }
 0x576   :  { %2153 = vtanh.f32 %v809_v34  ;;  %v832_v55 = vor.u32 1.1754944e-38, %v831_v43  ;;  %vm830_vm4 = vcmp.eq.f32.partialorder %v829_v46, 8.507059e+37 }
 0x577   :  { %2155 = vtanh.f32 %v811_v36  ;;  %v847_v59 = vor.u32 1.1754944e-38, %v846_v44  ;;  %vm845_vm5 = vcmp.eq.f32.partialorder %v844_v49, 8.507059e+37 }
 0x578   :  { %2157 = vpow2.f32 %v1995_v39 }
 0x57a   :  { %v2150_v35 = vpop.eup %2149 }
 0x57b   :  { %v2152_v37 = vpop.eup %2151  ;;  %v821_v38 = vmul.f32 %v2150_v35, %v818_v28  ;;  %vm826_vm12 = vweird.f32 %v2150_v35 }
 0x57c   :  { %v836_v40 = vmul.f32 %v2152_v37, %v819_v29  ;;  %vm841_vm13 = vweird.f32 %v2152_v37  ;;  %vm827_vm1 = vmor %vm825_vm14, %vm826_vm12  ;;  %v2154_v56 = vpop.eup %2153  ;;  %vm1702_vm12 = vcmask 1041408  }
 0x57d   :  { %v822_v41 = vsub.f32 1.0, %v821_v38  ;;  %vm842_vm2 = vmor %vm840_vm15, %vm841_vm13  ;;  %v2156_v61 = vpop.eup %2155  ;;  %vm1699_vm13 = vcmask 1040384  }
 0x57e   :  { %v837_v42 = vsub.f32 1.0, %v836_v40  ;;  %v2158_v10 = vpop.eup %2157 }
 0x57f   :  { %v823_v45 = vmul.f32 %v2150_v35, %v822_v41  ;;  %v859_v11 = vadd.f32 1.0, %v2158_v10 }
 0x580   :  { %v838_v48 = vmul.f32 %v2152_v37, %v837_v42 }
 0x581   :  { %v824_v51 = vadd.f32 %v2150_v35, %v823_v45  ;;  %2159 = vrcp.f32 %v859_v11  ;;  %v886_v58 = vand.u32 2147483648, %v859_v11  ;;  %vm880_vm9 = vweird.f32 %v859_v11 }
 0x582   :  { %v839_v54 = vadd.f32 %v2152_v37, %v838_v48  ;;  %2161 = vpow2.f32 %v1994_v15  ;;  %v884_v28 = vand.u32 2147483647, %v859_v11 }
 0x583   :  { %v828_v60 = vsel %vm827_vm1, %v2150_v35, %v824_v51  ;;  %v887_v30 = vor.u32 1.1754944e-38, %v886_v58 }
 0x584   :  { %v843_v1 = vsel %vm842_vm2, %v2152_v37, %v839_v54  ;;  %v833_v2 = vsel %vm830_vm4, %v832_v55, %v828_v60  ;;  %vm885_vm11 = vcmp.eq.f32.partialorder %v884_v28, 8.507059e+37  ;;  %v1701_v37 = vsel %vm1699_vm13, %v2590_v17, %v2626_v0 }
 0x585   :  { %v848_v4 = vsel %vm845_vm5, %v847_v59, %v843_v1  ;;  %v898_v5 = vmul.f32 %v2154_v56, %v833_v2  ;;  %v896_v7 = vmul.f32 %v892_v57, %v833_v2  ;;  %v1700_v56 = vsel %vm1699_vm13, %v2588_v13, %v2621_v53 }
 0x586   :  { %v899_v8 = vmul.f32 %v2156_v61, %v848_v4  ;;  %v897_v9 = vmul.f32 %v893_v62, %v848_v4 }
 0x587   :  { %902 = vrot.lane.b32.xlu1 %v898_v5, %s2293_s7  ;;  %v2160_v14 = vpop.eup %2159 }
 0x588   :  { %904 = vrot.lane.b32.xlu2 %v899_v8, %s2293_s7  ;;  %v876_v52 = vmul.f32 %v2160_v14, %v859_v11  ;;  %v2162_v63 = vpop.eup %2161  ;;  %vm881_vm8 = vweird.f32 %v2160_v14 }
 0x589   :  { %v858_v22 = vadd.f32 1.0, %v2162_v63  ;;  %vm882_vm10 = vmor %vm880_vm9, %vm881_vm8 }
 0x58a   :  { %v877_v18 = vsub.f32 1.0, %v876_v52 }
 0x58b   :  { %v871_v46 = vand.u32 2147483648, %v858_v22  ;;  %vm865_vm15 = vweird.f32 %v858_v22  ;;  %v869_v48 = vand.u32 2147483647, %v858_v22 }
 0x58c   :  { %v878_v21 = vmul.f32 %v2160_v14, %v877_v18 }
 0x58d   :  { %v872_v51 = vor.u32 1.1754944e-38, %v871_v46  ;;  %vm870_vm2 = vcmp.eq.f32.partialorder %v869_v48, 8.507059e+37 }
 0x58e   :  { %v879_v25 = vadd.f32 %v2160_v14, %v878_v21 }
 0x590   :  { %v883_v29 = vsel %vm882_vm10, %v2160_v14, %v879_v25 }
 0x591   :  { %v888_v34 = vsel %vm885_vm11, %v887_v30, %v883_v29 }
 0x5e2   :  { %v905_v23 = vpop.permute.xlu2 %904 }
 0x5e3   :  { %v2650_v24 = vadd.f32 %v905_v23, %v897_v9 }
 0x5e5   :  { %2163 = vtanh.f32 %v2650_v24 }
 0x5e6   :  { %2165 = vrcp.f32 %v858_v22 }
 0x5eb   :  { %v2164_v31 = vpop.eup %2163 }
 0x5ec   :  { %v2166_v35 = vpop.eup %2165  ;;  %v913_v36 = vmul.f32 %v2164_v31, %v888_v34 }
 0x5ed   :  { %v861_v40 = vmul.f32 %v2166_v35, %v858_v22  ;;  %vm866_vm14 = vweird.f32 %v2166_v35 }
 0x5ee   :  { %v2657_v38 = vsel %vm1702_vm12, %v1701_v37, %v913_v36  ;;  %vm867_vm1 = vmor %vm865_vm15, %vm866_vm14  ;;  %v915_v17 = vpack.c.bf16 %v913_v36, %v913_v36 }
 0x5ef   :  { %v862_v41 = vsub.f32 1.0, %v861_v40 }
 0x5f0   :  { %v919_v59 = vunpack.c.l.b16 %v915_v17 }
 0x5f1   :  { %v863_v42 = vmul.f32 %v2166_v35, %v862_v41 }
 0x5f2   :  { %v921_v1 = vrot.slane %v919_v59, 1 }
 0x5f3   :  { %v864_v45 = vadd.f32 %v2166_v35, %v863_v42 }
 0x5f5   :  { %v868_v49 = vsel %vm867_vm1, %v2166_v35, %v864_v45  ;;  %v1050_v45 = vrot.slane %v2650_v24, 7 }
 0x5f6   :  { %v873_v54 = vsel %vm870_vm2, %v872_v51, %v868_v49 }
 0x5f9   :  { %v903_v43 = vpop.permute.xlu1 %902 }
 0x5fa   :  { %v2659_v44 = vadd.f32 %v903_v43, %v896_v7 }
 0x5fc   :  { %2167 = vtanh.f32 %v2659_v44  ;;  %v1049_v40 = vrot.slane %v2659_v44, 7 }
 0x602   :  { %v2168_v0 = vpop.eup %2167 }
 0x603   :  { %v912_v55 = vmul.f32 %v2168_v0, %v873_v54 }
 0x605   :  { %v914_v57 = vpack.c.bf16 %v912_v55, %v912_v55  ;;  %v2666_v60 = vsel %vm1702_vm12, %v1700_v56, %v912_v55 }
 0x607   :  { %v918_v61 = vunpack.c.l.b16 %v914_v57 }
 0x609   :  { %v920_v62 = vrot.slane %v918_v61, 2 }
 0x60b   :  { %v922_v2 = vsel %vm610_vm6, %v921_v1, %v920_v62 }
 0x60c   :  { %v923_v4 = vpack.c.b16 %v922_v2, %v922_v2 }
 0x60e   :  { %924 = vrot.lane.b32.xlu0 %v923_v4, %s2293_s7 }
 0x680   :  { %v925_v5 = vpop.permute.xlu0 %924 }
 0x681   :  { %1996 = vmatmul.msk.bf16.vlgmr.msra.gmra.mxu0 %vm465_vm7, %v925_v5  ;;  %1997 = vmatmul.msk.bf16.vlgmr.msra.gmra.mxu1 %vm465_vm7, %v925_v5 }
 0x682   :  { %1561 = vmatpush.bf16.msra.mxu0 %v2468_v12  ;;  %1574 = vmatpush.bf16.msra.mxu1 %v2479_v16 }
 0x686   :  { %1562 = vmatpush.bf16.msra.mxu0 %v2488_v19  ;;  %1575 = vmatpush.bf16.msra.mxu1 %v2492_v20 }
 0x68a   :  { %1563 = vmatpush.bf16.msra.mxu0 %v2508_v26  ;;  %1576 = vmatpush.bf16.msra.mxu1 %v2512_v27 }
 0x68e   :  { %1564 = vmatpush.bf16.msra.mxu0 %v2528_v32  ;;  %1577 = vmatpush.bf16.msra.mxu1 %v2532_v33 }
 0x6fe   :  { %v938_v13 = vpop.f32.mrf.mxu0  ;;  %v951_v53 = vpop.f32.mrf.mxu1 }
 0x6ff   :  { %v957_v7 = vrot.slane %v938_v13, 5  ;;  %v959_v8 = vrot.slane %v938_v13, 6  ;;  %v958_v33 = vrot.slane %v951_v53, 5  ;;  %v960_v11 = vrot.slane %v951_v53, 6 }
 0x701   :  { %v965_v12 = vadd.f32 %v957_v7, %v2568_v47  ;;  %v967_v16 = vadd.f32 %v959_v8, %v2570_v50  ;;  %v966_v14 = vadd.f32 %v958_v33, %v2574_v3  ;;  %v968_v52 = vadd.f32 %v960_v11, %v2576_v6 }
 0x703   :  { %v1998_v9 = vmul.f32 -1.442695, %v965_v12  ;;  %v1999_v19 = vmul.f32 -1.442695, %v967_v16  ;;  %v2001_v44 = vmul.f32 -1.442695, %v968_v52 }
 0x704   :  { %v2000_v59 = vmul.f32 -1.442695, %v966_v14 }
 0x705   :  { %2169 = vpow2.f32 %v1998_v9 }
 0x706   :  { %2171 = vpow2.f32 %v1999_v19  ;;  %v940_v20 = vpop.f32.mrf.mxu0  ;;  %v953_v26 = vpop.f32.mrf.mxu1 }
 0x70b   :  { %v2170_v39 = vpop.eup %2169 }
 0x70c   :  { %v2172_v27 = vpop.eup %2171  ;;  %v975_v10 = vadd.f32 1.0, %v2170_v39 }
 0x70d   :  { %v976_v32 = vadd.f32 1.0, %v2172_v27 }
 0x70e   :  { %2173 = vrcp.f32 %v975_v10  ;;  %v988_v25 = vand.u32 2147483648, %v975_v10  ;;  %v986_v29 = vand.u32 2147483647, %v975_v10  ;;  %vm982_vm8 = vweird.f32 %v975_v10 }
 0x70f   :  { %2175 = vrcp.f32 %v976_v32  ;;  %v1003_v58 = vand.u32 2147483648, %v976_v32  ;;  %v1001_v31 = vand.u32 2147483647, %v976_v32  ;;  %vm997_vm9 = vweird.f32 %v976_v32 }
 0x710   :  { %2177 = vtanh.f32 %v966_v14  ;;  %v989_v36 = vor.u32 1.1754944e-38, %v988_v25  ;;  %vm987_vm12 = vcmp.eq.f32.partialorder %v986_v29, 8.507059e+37 }
 0x711   :  { %2179 = vtanh.f32 %v968_v52  ;;  %v1004_v41 = vor.u32 1.1754944e-38, %v1003_v58  ;;  %vm1002_vm13 = vcmp.eq.f32.partialorder %v1001_v31, 8.507059e+37 }
 0x712   :  { %2181 = vpow2.f32 %v2001_v44 }
 0x714   :  { %v2174_v15 = vpop.eup %2173 }
 0x715   :  { %v2176_v18 = vpop.eup %2175  ;;  %v978_v63 = vmul.f32 %v2174_v15, %v975_v10  ;;  %vm983_vm4 = vweird.f32 %v2174_v15 }
 0x716   :  { %v993_v21 = vmul.f32 %v2176_v18, %v976_v32  ;;  %vm998_vm5 = vweird.f32 %v2176_v18  ;;  %vm984_vm10 = vmor %vm982_vm8, %vm983_vm4  ;;  %v2178_v37 = vpop.eup %2177  ;;  %vm1705_vm4 = vcmask 1042432  }
 0x717   :  { %v979_v22 = vsub.f32 1.0, %v978_v63  ;;  %vm999_vm11 = vmor %vm997_vm9, %vm998_vm5  ;;  %v2180_v43 = vpop.eup %2179 }
 0x718   :  { %v994_v23 = vsub.f32 1.0, %v993_v21  ;;  %v2182_v55 = vpop.eup %2181 }
 0x719   :  { %v980_v28 = vmul.f32 %v2174_v15, %v979_v22  ;;  %v1016_v56 = vadd.f32 1.0, %v2182_v55 }
 0x71a   :  { %v995_v30 = vmul.f32 %v2176_v18, %v994_v23 }
 0x71b   :  { %v981_v34 = vadd.f32 %v2174_v15, %v980_v28  ;;  %2183 = vrcp.f32 %v1016_v56  ;;  %v1043_v53 = vand.u32 2147483648, %v1016_v56  ;;  %vm1037_vm15 = vweird.f32 %v1016_v56 }
 0x71c   :  { %v996_v35 = vadd.f32 %v2176_v18, %v995_v30  ;;  %2185 = vpow2.f32 %v2000_v59  ;;  %v1041_v7 = vand.u32 2147483647, %v1016_v56 }
 0x71d   :  { %v985_v42 = vsel %vm984_vm10, %v2174_v15, %v981_v34  ;;  %v1044_v12 = vor.u32 1.1754944e-38, %v1043_v53 }
 0x71e   :  { %v1000_v46 = vsel %vm999_vm11, %v2176_v18, %v996_v35  ;;  %v990_v48 = vsel %vm987_vm12, %v989_v36, %v985_v42  ;;  %vm1042_vm2 = vcmp.eq.f32.partialorder %v1041_v7, 8.507059e+37 }
 0x71f   :  { %v1005_v49 = vsel %vm1002_vm13, %v1004_v41, %v1000_v46  ;;  %v1055_v51 = vmul.f32 %v2178_v37, %v990_v48  ;;  %v1053_v17 = vmul.f32 %v1049_v40, %v990_v48 }
 0x720   :  { %v1056_v0 = vmul.f32 %v2180_v43, %v1005_v49  ;;  %v1054_v54 = vmul.f32 %v1050_v45, %v1005_v49 }
 0x721   :  { %1059 = vrot.lane.b32.xlu1 %v1055_v51, %s2293_s7  ;;  %v2184_v57 = vpop.eup %2183 }
 0x722   :  { %1061 = vrot.lane.b32.xlu2 %v1056_v0, %s2293_s7  ;;  %v1033_v24 = vmul.f32 %v2184_v57, %v1016_v56  ;;  %v2186_v62 = vpop.eup %2185  ;;  %vm1038_vm14 = vweird.f32 %v2184_v57 }
 0x723   :  { %v1015_v2 = vadd.f32 1.0, %v2186_v62  ;;  %vm1039_vm1 = vmor %vm1037_vm15, %vm1038_vm14 }
 0x724   :  { %v1034_v61 = vsub.f32 1.0, %v1033_v24 }
 0x725   :  { %v1028_v14 = vand.u32 2147483648, %v1015_v2  ;;  %vm1022_vm8 = vweird.f32 %v1015_v2  ;;  %v1026_v15 = vand.u32 2147483647, %v1015_v2 }
 0x726   :  { %v1035_v1 = vmul.f32 %v2184_v57, %v1034_v61 }
 0x727   :  { %v1029_v18 = vor.u32 1.1754944e-38, %v1028_v14  ;;  %vm1027_vm10 = vcmp.eq.f32.partialorder %v1026_v15, 8.507059e+37 }
 0x728   :  { %v1036_v13 = vadd.f32 %v2184_v57, %v1035_v1 }
 0x72a   :  { %v1040_v8 = vsel %vm1039_vm1, %v2184_v57, %v1036_v13 }
 0x72b   :  { %v1045_v9 = vsel %vm1042_vm2, %v1044_v12, %v1040_v8 }
 0x77c   :  { %v1062_v4 = vpop.permute.xlu2 %1061 }
 0x77d   :  { %v2688_v5 = vadd.f32 %v1062_v4, %v1054_v54 }
 0x77f   :  { %2187 = vtanh.f32 %v2688_v5 }
 0x780   :  { %2189 = vrcp.f32 %v1015_v2 }
 0x785   :  { %v2188_v16 = vpop.eup %2187 }
 0x786   :  { %v2190_v19 = vpop.eup %2189  ;;  %v1070_v20 = vmul.f32 %v2188_v16, %v1045_v9 }
 0x787   :  { %v1018_v39 = vmul.f32 %v2190_v19, %v1015_v2  ;;  %vm1023_vm5 = vweird.f32 %v2190_v19 }
 0x788   :  { %v2693_v26 = vsel %vm1705_vm4, %v2657_v38, %v1070_v20  ;;  %vm1024_vm9 = vmor %vm1022_vm8, %vm1023_vm5  ;;  %v1072_v63 = vpack.c.bf16 %v1070_v20, %v1070_v20 }
 0x789   :  { %v1019_v27 = vsub.f32 1.0, %v1018_v39 }
 0x78a   :  { %v1076_v25 = vunpack.c.l.b16 %v1072_v63 }
 0x78b   :  { %v1020_v10 = vmul.f32 %v2190_v19, %v1019_v27 }
 0x78c   :  { %v1078_v30 = vrot.slane %v1076_v25, 2 }
 0x78d   :  { %v1021_v11 = vadd.f32 %v2190_v19, %v1020_v10 }
 0x78f   :  { %v1025_v52 = vsel %vm1024_vm9, %v2190_v19, %v1021_v11 }
 0x790   :  { %v1030_v21 = vsel %vm1027_vm10, %v1029_v18, %v1025_v52 }
 0x793   :  { %v1060_v32 = vpop.permute.xlu1 %1059 }
 0x794   :  { %v2695_v33 = vadd.f32 %v1060_v32, %v1053_v17  ;;  %v1207_v32 = vrot.slane %v2688_v5, 7 }
 0x796   :  { %2191 = vtanh.f32 %v2695_v33  ;;  %v1206_v20 = vrot.slane %v2695_v33, 7 }
 0x79c   :  { %v2192_v38 = vpop.eup %2191 }
 0x79d   :  { %v1069_v22 = vmul.f32 %v2192_v38, %v1030_v21 }
 0x79f   :  { %v1071_v23 = vpack.c.bf16 %v1069_v22, %v1069_v22  ;;  %v2700_v58 = vsel %vm1705_vm4, %v2666_v60, %v1069_v22 }
 0x7a1   :  { %v1075_v28 = vunpack.c.l.b16 %v1071_v23 }
 0x7a3   :  { %v1077_v29 = vrot.slane %v1075_v28, 3 }
 0x7a5   :  { %v1079_v31 = vsel %vm610_vm6, %v1078_v30, %v1077_v29 }
 0x7a6   :  { %v1080_v34 = vpack.c.b16 %v1079_v31, %v1079_v31 }
 0x7a8   :  { %1081 = vrot.lane.b32.xlu0 %v1080_v34, %s2293_s7 }
 0x81a   :  { %v1082_v35 = vpop.permute.xlu0 %1081 }
 0x81b   :  { %2002 = vmatmul.msk.bf16.vlgmr.msrb.gmra.mxu2 %vm465_vm7, %v1082_v35  ;;  %2003 = vmatmul.msk.bf16.vlgmr.msrb.gmra.mxu3 %vm465_vm7, %v1082_v35 }
 0x89e   :  { %v1095_v36 = vpop.f32.mrf.mxu2  ;;  %v1108_v37 = vpop.f32.mrf.mxu3 }
 0x89f   :  { %v1114_v40 = vrot.slane %v1095_v36, 4  ;;  %v1116_v41 = vrot.slane %v1095_v36, 5  ;;  %v1115_v54 = vrot.slane %v1108_v37, 4  ;;  %v1117_v44 = vrot.slane %v1108_v37, 5 }
 0x8a1   :  { %v1122_v60 = vadd.f32 %v1114_v40, %v2568_v47  ;;  %v1124_v42 = vadd.f32 %v1116_v41, %v2570_v50  ;;  %v1123_v55 = vadd.f32 %v1115_v54, %v2574_v3  ;;  %v1125_v57 = vadd.f32 %v1117_v44, %v2576_v6 }
 0x8a3   :  { %v2004_v43 = vmul.f32 -1.442695, %v1122_v60  ;;  %v2005_v45 = vmul.f32 -1.442695, %v1124_v42  ;;  %v2007_v33 = vmul.f32 -1.442695, %v1125_v57 }
 0x8a4   :  { %v2006_v25 = vmul.f32 -1.442695, %v1123_v55 }
 0x8a5   :  { %2193 = vpow2.f32 %v2004_v43 }
 0x8a6   :  { %2195 = vpow2.f32 %v2005_v45  ;;  %v1097_v46 = vpop.f32.mrf.mxu2  ;;  %v1110_v48 = vpop.f32.mrf.mxu3 }
 0x8ab   :  { %v2194_v49 = vpop.eup %2193 }
 0x8ac   :  { %v2196_v51 = vpop.eup %2195  ;;  %v1132_v17 = vadd.f32 1.0, %v2194_v49 }
 0x8ad   :  { %v1133_v0 = vadd.f32 1.0, %v2196_v51 }
 0x8ae   :  { %2197 = vrcp.f32 %v1132_v17  ;;  %v1145_v2 = vand.u32 2147483648, %v1132_v17  ;;  %v1143_v53 = vand.u32 2147483647, %v1132_v17  ;;  %vm1139_vm13 = vweird.f32 %v1132_v17 }
 0x8af   :  { %2199 = vrcp.f32 %v1133_v0  ;;  %v1160_v4 = vand.u32 2147483648, %v1133_v0  ;;  %v1158_v8 = vand.u32 2147483647, %v1133_v0  ;;  %vm1154_vm14 = vweird.f32 %v1133_v0 }
 0x8b0   :  { %2201 = vtanh.f32 %v1123_v55  ;;  %v1146_v9 = vor.u32 1.1754944e-38, %v1145_v2  ;;  %vm1144_vm2 = vcmp.eq.f32.partialorder %v1143_v53, 8.507059e+37 }
 0x8b1   :  { %2203 = vtanh.f32 %v1125_v57  ;;  %v1161_v39 = vor.u32 1.1754944e-38, %v1160_v4  ;;  %vm1159_vm4 = vcmp.eq.f32.partialorder %v1158_v8, 8.507059e+37 }
 0x8b2   :  { %2205 = vpow2.f32 %v2007_v33 }
 0x8b4   :  { %v2198_v56 = vpop.eup %2197 }
 0x8b5   :  { %v2200_v59 = vpop.eup %2199  ;;  %v1135_v24 = vmul.f32 %v2198_v56, %v1132_v17  ;;  %vm1140_vm11 = vweird.f32 %v2198_v56 }
 0x8b6   :  { %v1150_v61 = vmul.f32 %v2200_v59, %v1133_v0  ;;  %vm1155_vm12 = vweird.f32 %v2200_v59  ;;  %vm1141_vm15 = vmor %vm1139_vm13, %vm1140_vm11  ;;  %v2202_v19 = vpop.eup %2201 }
 0x8b7   :  { %v1136_v62 = vsub.f32 1.0, %v1135_v24  ;;  %vm1156_vm1 = vmor %vm1154_vm14, %vm1155_vm12  ;;  %v2204_v10 = vpop.eup %2203 }
 0x8b8   :  { %v1151_v1 = vsub.f32 1.0, %v1150_v61  ;;  %v2206_v21 = vpop.eup %2205 }
 0x8b9   :  { %v1137_v13 = vmul.f32 %v2198_v56, %v1136_v62  ;;  %v1173_v22 = vadd.f32 1.0, %v2206_v21 }
 0x8ba   :  { %v1152_v7 = vmul.f32 %v2200_v59, %v1151_v1 }
 0x8bb   :  { %v1138_v12 = vadd.f32 %v2198_v56, %v1137_v13  ;;  %2207 = vrcp.f32 %v1173_v22  ;;  %v1200_v37 = vand.u32 2147483648, %v1173_v22  ;;  %vm1194_vm8 = vweird.f32 %v1173_v22 }
 0x8bc   :  { %v1153_v16 = vadd.f32 %v2200_v59, %v1152_v7  ;;  %2209 = vpow2.f32 %v2006_v25  ;;  %v1198_v40 = vand.u32 2147483647, %v1173_v22 }
 0x8bd   :  { %v1142_v27 = vsel %vm1141_vm15, %v2198_v56, %v1138_v12  ;;  %v1201_v60 = vor.u32 1.1754944e-38, %v1200_v37 }
 0x8be   :  { %v1157_v11 = vsel %vm1156_vm1, %v2200_v59, %v1153_v16  ;;  %v1147_v14 = vsel %vm1144_vm2, %v1146_v9, %v1142_v27  ;;  %vm1199_vm10 = vcmp.eq.f32.partialorder %v1198_v40, 8.507059e+37 }
 0x8bf   :  { %v1162_v15 = vsel %vm1159_vm4, %v1161_v39, %v1157_v11  ;;  %v1212_v52 = vmul.f32 %v2202_v19, %v1147_v14  ;;  %v1210_v18 = vmul.f32 %v1206_v20, %v1147_v14 }
 0x8c0   :  { %v1213_v63 = vmul.f32 %v2204_v10, %v1162_v15  ;;  %v1211_v38 = vmul.f32 %v1207_v32, %v1162_v15 }
 0x8c1   :  { %1216 = vrot.lane.b32.xlu1 %v1212_v52, %s2293_s7  ;;  %v2208_v23 = vpop.eup %2207 }
 0x8c2   :  { %1218 = vrot.lane.b32.xlu2 %v1213_v63, %s2293_s7  ;;  %v1190_v5 = vmul.f32 %v2208_v23, %v1173_v22  ;;  %v2210_v29 = vpop.eup %2209  ;;  %vm1195_vm5 = vweird.f32 %v2208_v23 }
 0x8c3   :  { %v1172_v31 = vadd.f32 1.0, %v2210_v29  ;;  %vm1196_vm9 = vmor %vm1194_vm8, %vm1195_vm5 }
 0x8c4   :  { %v1191_v28 = vsub.f32 1.0, %v1190_v5 }
 0x8c5   :  { %v1185_v55 = vand.u32 2147483648, %v1172_v31  ;;  %vm1179_vm12 = vweird.f32 %v1172_v31  ;;  %v1183_v56 = vand.u32 2147483647, %v1172_v31 }
 0x8c6   :  { %v1192_v30 = vmul.f32 %v2208_v23, %v1191_v28 }
 0x8c7   :  { %v1186_v59 = vor.u32 1.1754944e-38, %v1185_v55  ;;  %vm1184_vm14 = vcmp.eq.f32.partialorder %v1183_v56, 8.507059e+37 }
 0x8c8   :  { %v1193_v36 = vadd.f32 %v2208_v23, %v1192_v30 }
 0x8ca   :  { %v1197_v41 = vsel %vm1196_vm9, %v2208_v23, %v1193_v36 }
 0x8cb   :  { %v1202_v43 = vsel %vm1199_vm10, %v1201_v60, %v1197_v41 }
 0x91c   :  { %v1219_v34 = vpop.permute.xlu2 %1218 }
 0x91d   :  { %v2714_v35 = vadd.f32 %v1219_v34, %v1211_v38 }
 0x91f   :  { %2211 = vtanh.f32 %v2714_v35 }
 0x920   :  { %2213 = vrcp.f32 %v1172_v31 }
 0x925   :  { %v2212_v42 = vpop.eup %2211 }
 0x926   :  { %v2214_v45 = vpop.eup %2213  ;;  %v1227_v46 = vmul.f32 %v2212_v42, %v1202_v43 }
 0x927   :  { %v1175_v49 = vmul.f32 %v2214_v45, %v1172_v31  ;;  %vm1180_vm11 = vweird.f32 %v2214_v45 }
 0x928   :  { %v2719_v48 = vsel %vm74_vm0, %v2693_v26, %v1227_v46  ;;  %vm1181_vm13 = vmor %vm1179_vm12, %vm1180_vm11  ;;  %v1229_v24 = vpack.c.bf16 %v1227_v46, %v1227_v46 }
 0x929   :  { %v1176_v51 = vsub.f32 1.0, %v1175_v49 }
 0x92a   :  { %v1233_v2 = vunpack.c.l.b16 %v1229_v24 }
 0x92b   :  { %v1177_v17 = vmul.f32 %v2214_v45, %v1176_v51 }
 0x92c   :  { %v1235_v7 = vrot.slane %v1233_v2, 3 }
 0x92d   :  { %v1178_v44 = vadd.f32 %v2214_v45, %v1177_v17 }
 0x92f   :  { %v1182_v57 = vsel %vm1181_vm13, %v2214_v45, %v1178_v44 }
 0x930   :  { %v1187_v61 = vsel %vm1184_vm14, %v1186_v59, %v1182_v57  ;;  %vm1710_vm14 = vcmask 1044480  }
 0x933   :  { %v1217_v0 = vpop.permute.xlu1 %1216 }
 0x934   :  { %v2721_v54 = vadd.f32 %v1217_v0, %v1210_v18  ;;  %v1364_v0 = vrot.slane %v2714_v35, 7 }
 0x936   :  { %2215 = vtanh.f32 %v2721_v54  ;;  %v1363_v46 = vrot.slane %v2721_v54, 7 }
 0x93c   :  { %v2216_v26 = vpop.eup %2215 }
 0x93d   :  { %v1226_v62 = vmul.f32 %v2216_v26, %v1187_v61 }
 0x93f   :  { %v1228_v1 = vpack.c.bf16 %v1226_v62, %v1226_v62  ;;  %v2726_v4 = vsel %vm74_vm0, %v2700_v58, %v1226_v62 }
 0x941   :  { %v1232_v13 = vunpack.c.l.b16 %v1228_v1 }
 0x943   :  { %v1234_v53 = vrot.slane %v1232_v13, 4 }
 0x945   :  { %v1236_v8 = vsel %vm610_vm6, %v1235_v7, %v1234_v53 }
 0x946   :  { %v1237_v12 = vpack.c.b16 %v1236_v8, %v1236_v8 }
 0x948   :  { %1238 = vrot.lane.b32.xlu0 %v1237_v12, %s2293_s7 }
 0x9ba   :  { %v1239_v16 = vpop.permute.xlu0 %1238 }
 0x9bb   :  { %2008 = vmatmul.msk.bf16.vlgmr.msrb.gmra.mxu0 %vm465_vm7, %v1239_v16  ;;  %2009 = vmatmul.msk.bf16.vlgmr.msrb.gmra.mxu1 %vm465_vm7, %v1239_v16 }
 0xa38   :  { %v1252_v9 = vpop.f32.mrf.mxu0  ;;  %v1265_v19 = vpop.f32.mrf.mxu1 }
 0xa39   :  { %v1271_v20 = vrot.slane %v1252_v9, 3  ;;  %v1273_v39 = vrot.slane %v1252_v9, 4  ;;  %v1272_v38 = vrot.slane %v1265_v19, 3  ;;  %v1274_v33 = vrot.slane %v1265_v19, 4 }
 0xa3b   :  { %v1279_v58 = vadd.f32 %v1271_v20, %v2568_v47  ;;  %v1281_v27 = vadd.f32 %v1273_v39, %v2570_v50  ;;  %v1280_v21 = vadd.f32 %v1272_v38, %v2574_v3  ;;  %v1282_v23 = vadd.f32 %v1274_v33, %v2576_v6 }
 0xa3d   :  { %v2010_v10 = vmul.f32 -1.442695, %v1279_v58  ;;  %v2011_v32 = vmul.f32 -1.442695, %v1281_v27  ;;  %v2013_v54 = vmul.f32 -1.442695, %v1282_v23 }
 0xa3e   :  { %v2012_v2 = vmul.f32 -1.442695, %v1280_v21 }
 0xa3f   :  { %2217 = vpow2.f32 %v2010_v10 }
 0xa40   :  { %2219 = vpow2.f32 %v2011_v32  ;;  %v1254_v11 = vpop.f32.mrf.mxu0  ;;  %v1267_v14 = vpop.f32.mrf.mxu1 }
 0xa45   :  { %v2218_v15 = vpop.eup %2217 }
 0xa46   :  { %v2220_v52 = vpop.eup %2219  ;;  %v1289_v18 = vadd.f32 1.0, %v2218_v15 }
 0xa47   :  { %v1290_v63 = vadd.f32 1.0, %v2220_v52 }
 0xa48   :  { %2221 = vrcp.f32 %v1289_v18  ;;  %v1302_v31 = vand.u32 2147483648, %v1289_v18  ;;  %v1300_v37 = vand.u32 2147483647, %v1289_v18  ;;  %vm1296_vm1 = vweird.f32 %v1289_v18 }
 0xa49   :  { %2223 = vrcp.f32 %v1290_v63  ;;  %v1317_v34 = vand.u32 2147483648, %v1290_v63  ;;  %v1315_v41 = vand.u32 2147483647, %v1290_v63  ;;  %vm1311_vm2 = vweird.f32 %v1290_v63 }
 0xa4a   :  { %2225 = vtanh.f32 %v1280_v21  ;;  %v1303_v43 = vor.u32 1.1754944e-38, %v1302_v31  ;;  %vm1301_vm8 = vcmp.eq.f32.partialorder %v1300_v37, 8.507059e+37 }
 0xa4b   :  { %2227 = vtanh.f32 %v1282_v23  ;;  %v1318_v49 = vor.u32 1.1754944e-38, %v1317_v34  ;;  %vm1316_vm9 = vcmp.eq.f32.partialorder %v1315_v41, 8.507059e+37 }
 0xa4c   :  { %2229 = vpow2.f32 %v2013_v54 }
 0xa4e   :  { %v2222_v22 = vpop.eup %2221 }
 0xa4f   :  { %v2224_v25 = vpop.eup %2223  ;;  %v1292_v5 = vmul.f32 %v2222_v22, %v1289_v18  ;;  %vm1297_vm0 = vweird.f32 %v2222_v22 }
 0xa50   :  { %v1307_v28 = vmul.f32 %v2224_v25, %v1290_v63  ;;  %vm1312_vm15 = vweird.f32 %v2224_v25  ;;  %vm1298_vm4 = vmor %vm1296_vm1, %vm1297_vm0  ;;  %v2226_v45 = vpop.eup %2225 }
 0xa51   :  { %v1293_v29 = vsub.f32 1.0, %v1292_v5  ;;  %vm1313_vm5 = vmor %vm1311_vm2, %vm1312_vm15  ;;  %v2228_v17 = vpop.eup %2227 }
 0xa52   :  { %v1308_v30 = vsub.f32 1.0, %v1307_v28  ;;  %v2230_v61 = vpop.eup %2229 }
 0xa53   :  { %v1294_v36 = vmul.f32 %v2222_v22, %v1293_v29  ;;  %v1330_v62 = vadd.f32 1.0, %v2230_v61 }
 0xa54   :  { %v1309_v40 = vmul.f32 %v2224_v25, %v1308_v30 }
 0xa55   :  { %v1295_v60 = vadd.f32 %v2222_v22, %v1294_v36  ;;  %2231 = vrcp.f32 %v1330_v62  ;;  %v1357_v19 = vand.u32 2147483648, %v1330_v62  ;;  %vm1351_vm11 = vweird.f32 %v1330_v62 }
 0xa56   :  { %v1310_v42 = vadd.f32 %v2224_v25, %v1309_v40  ;;  %2233 = vpow2.f32 %v2012_v2  ;;  %v1355_v20 = vand.u32 2147483647, %v1330_v62 }
 0xa57   :  { %v1299_v51 = vsel %vm1298_vm4, %v2222_v22, %v1295_v60  ;;  %v1358_v58 = vor.u32 1.1754944e-38, %v1357_v19 }
 0xa58   :  { %v1314_v44 = vsel %vm1313_vm5, %v2224_v25, %v1310_v42  ;;  %v1304_v55 = vsel %vm1301_vm8, %v1303_v43, %v1299_v51  ;;  %vm1356_vm13 = vcmp.eq.f32.partialorder %v1355_v20, 8.507059e+37 }
 0xa59   :  { %v1319_v56 = vsel %vm1316_vm9, %v1318_v49, %v1314_v44  ;;  %v1369_v57 = vmul.f32 %v2226_v45, %v1304_v55  ;;  %v1367_v59 = vmul.f32 %v1363_v46, %v1304_v55 }
 0xa5a   :  { %v1370_v24 = vmul.f32 %v2228_v17, %v1319_v56  ;;  %v1368_v26 = vmul.f32 %v1364_v0, %v1319_v56 }
 0xa5b   :  { %1373 = vrot.lane.b32.xlu1 %v1369_v57, %s2293_s7  ;;  %v2232_v1 = vpop.eup %2231 }
 0xa5c   :  { %1375 = vrot.lane.b32.xlu2 %v1370_v24, %s2293_s7  ;;  %v1347_v35 = vmul.f32 %v2232_v1, %v1330_v62  ;;  %v2234_v53 = vpop.eup %2233  ;;  %vm1352_vm10 = vweird.f32 %v2232_v1 }
 0xa5d   :  { %v1329_v8 = vadd.f32 1.0, %v2234_v53  ;;  %vm1353_vm12 = vmor %vm1351_vm11, %vm1352_vm10 }
 0xa5e   :  { %v1348_v13 = vsub.f32 1.0, %v1347_v35 }
 0xa5f   :  { %v1342_v21 = vand.u32 2147483648, %v1329_v8  ;;  %vm1336_vm15 = vweird.f32 %v1329_v8  ;;  %v1340_v22 = vand.u32 2147483647, %v1329_v8 }
 0xa60   :  { %v1349_v7 = vmul.f32 %v2232_v1, %v1348_v13 }
 0xa61   :  { %v1343_v25 = vor.u32 1.1754944e-38, %v1342_v21  ;;  %vm1341_vm2 = vcmp.eq.f32.partialorder %v1340_v22, 8.507059e+37 }
 0xa62   :  { %v1350_v9 = vadd.f32 %v2232_v1, %v1349_v7 }
 0xa64   :  { %v1354_v39 = vsel %vm1353_vm12, %v2232_v1, %v1350_v9 }
 0xa65   :  { %v1359_v10 = vsel %vm1356_vm13, %v1358_v58, %v1354_v39 }
 0xab6   :  { %v1376_v12 = vpop.permute.xlu2 %1375 }
 0xab7   :  { %v2740_v16 = vadd.f32 %v1376_v12, %v1368_v26 }
 0xab9   :  { %2235 = vtanh.f32 %v2740_v16 }
 0xaba   :  { %2237 = vrcp.f32 %v1329_v8 }
 0xabf   :  { %v2236_v27 = vpop.eup %2235 }
 0xac0   :  { %v2238_v32 = vpop.eup %2237  ;;  %v1384_v11 = vmul.f32 %v2236_v27, %v1359_v10 }
 0xac1   :  { %v1332_v15 = vmul.f32 %v2238_v32, %v1329_v8  ;;  %vm1337_vm0 = vweird.f32 %v2238_v32 }
 0xac2   :  { %v2745_v14 = vsel %vm1710_vm14, %v2719_v48, %v1384_v11  ;;  %vm1338_vm1 = vmor %vm1336_vm15, %vm1337_vm0  ;;  %v1386_v5 = vpack.c.bf16 %v1384_v11, %v1384_v11 }
 0xac3   :  { %v1333_v52 = vsub.f32 1.0, %v1332_v15 }
 0xac4   :  { %v1390_v31 = vunpack.c.l.b16 %v1386_v5 }
 0xac5   :  { %v1334_v18 = vmul.f32 %v2238_v32, %v1333_v52 }
 0xac6   :  { %v1392_v40 = vrot.slane %v1390_v31, 4 }
 0xac7   :  { %v1335_v33 = vadd.f32 %v2238_v32, %v1334_v18 }
 0xac9   :  { %v1339_v23 = vsel %vm1338_vm1, %v2238_v32, %v1335_v33 }
 0xaca   :  { %v1344_v28 = vsel %vm1341_vm2, %v1343_v25, %v1339_v23  ;;  %vm1713_vm2 = vcmask 1045504  }
 0xacd   :  { %v1374_v63 = vpop.permute.xlu1 %1373 }
 0xace   :  { %v2747_v38 = vadd.f32 %v1374_v63, %v1367_v59  ;;  %v1521_v63 = vrot.slane %v2740_v16, 7 }
 0xad0   :  { %2239 = vtanh.f32 %v2747_v38  ;;  %v1520_v11 = vrot.slane %v2747_v38, 7 }
 0xad6   :  { %v2240_v48 = vpop.eup %2239 }
 0xad7   :  { %v1383_v29 = vmul.f32 %v2240_v48, %v1344_v28 }
 0xad9   :  { %v1385_v30 = vpack.c.bf16 %v1383_v29, %v1383_v29  ;;  %v2752_v34 = vsel %vm1710_vm14, %v2726_v4, %v1383_v29 }
 0xadb   :  { %v1389_v36 = vunpack.c.l.b16 %v1385_v30 }
 0xadd   :  { %v1391_v37 = vrot.slane %v1389_v36, 5 }
 0xadf   :  { %v1393_v41 = vsel %vm610_vm6, %v1392_v40, %v1391_v37 }
 0xae0   :  { %v1394_v60 = vpack.c.b16 %v1393_v41, %v1393_v41 }
 0xae2   :  { %1395 = vrot.lane.b32.xlu0 %v1394_v60, %s2293_s7 }
 0xb54   :  { %v1396_v42 = vpop.permute.xlu0 %1395 }
 0xb55   :  { %2014 = vmatmul.msk.bf16.vlgmr.msra.gmra.mxu2 %vm465_vm7, %v1396_v42  ;;  %2015 = vmatmul.msk.bf16.vlgmr.msra.gmra.mxu3 %vm465_vm7, %v1396_v42 }
 0xbd8   :  { %v1409_v43 = vpop.f32.mrf.mxu2  ;;  %v1422_v45 = vpop.f32.mrf.mxu3 }
 0xbd9   :  { %v1428_v46 = vrot.slane %v1409_v43, 2  ;;  %v1430_v49 = vrot.slane %v1409_v43, 3  ;;  %v1429_v26 = vrot.slane %v1422_v45, 2  ;;  %v1431_v54 = vrot.slane %v1422_v45, 3 }
 0xbdb   :  { %v1436_v4 = vadd.f32 %v1428_v46, %v2568_v47  ;;  %v1438_v51 = vadd.f32 %v1430_v49, %v2570_v50  ;;  %v1437_v61 = vadd.f32 %v1429_v26, %v2574_v3  ;;  %v1439_v1 = vadd.f32 %v1431_v54, %v2576_v6 }
 0xbdd   :  { %v2016_v17 = vmul.f32 -1.442695, %v1436_v4  ;;  %v2017_v0 = vmul.f32 -1.442695, %v1438_v51  ;;  %v2019_v38 = vmul.f32 -1.442695, %v1439_v1 }
 0xbde   :  { %v2018_v31 = vmul.f32 -1.442695, %v1437_v61 }
 0xbdf   :  { %2241 = vpow2.f32 %v2016_v17 }
 0xbe0   :  { %2243 = vpow2.f32 %v2017_v0  ;;  %v1411_v44 = vpop.f32.mrf.mxu2  ;;  %v1424_v55 = vpop.f32.mrf.mxu3 }
 0xbe5   :  { %v2242_v56 = vpop.eup %2241 }
 0xbe6   :  { %v2244_v57 = vpop.eup %2243  ;;  %v1446_v59 = vadd.f32 1.0, %v2242_v56 }
 0xbe7   :  { %v1447_v24 = vadd.f32 1.0, %v2244_v57 }
 0xbe8   :  { %2245 = vrcp.f32 %v1446_v59  ;;  %v1459_v8 = vand.u32 2147483648, %v1446_v59  ;;  %v1457_v19 = vand.u32 2147483647, %v1446_v59  ;;  %vm1453_vm8 = vweird.f32 %v1446_v59 }
 0xbe9   :  { %2247 = vrcp.f32 %v1447_v24  ;;  %v1474_v12 = vand.u32 2147483648, %v1447_v24  ;;  %v1472_v39 = vand.u32 2147483647, %v1447_v24  ;;  %vm1468_vm9 = vweird.f32 %v1447_v24 }
 0xbea   :  { %2249 = vtanh.f32 %v1437_v61  ;;  %v1460_v10 = vor.u32 1.1754944e-38, %v1459_v8  ;;  %vm1458_vm12 = vcmp.eq.f32.partialorder %v1457_v19, 8.507059e+37 }
 0xbeb   :  { %2251 = vtanh.f32 %v1439_v1  ;;  %v1475_v15 = vor.u32 1.1754944e-38, %v1474_v12  ;;  %vm1473_vm13 = vcmp.eq.f32.partialorder %v1472_v39, 8.507059e+37 }
 0xbec   :  { %2253 = vpow2.f32 %v2019_v38 }
 0xbee   :  { %v2246_v62 = vpop.eup %2245 }
 0xbef   :  { %v2248_v2 = vpop.eup %2247  ;;  %v1449_v35 = vmul.f32 %v2246_v62, %v1446_v59  ;;  %vm1454_vm4 = vweird.f32 %v2246_v62 }
 0xbf0   :  { %v1464_v13 = vmul.f32 %v2248_v2, %v1447_v24  ;;  %vm1469_vm5 = vweird.f32 %v2248_v2  ;;  %vm1455_vm10 = vmor %vm1453_vm8, %vm1454_vm4  ;;  %v2250_v32 = vpop.eup %2249 }
 0xbf1   :  { %v1450_v53 = vsub.f32 1.0, %v1449_v35  ;;  %vm1470_vm11 = vmor %vm1468_vm9, %vm1469_vm5  ;;  %v2252_v18 = vpop.eup %2251 }
 0xbf2   :  { %v1465_v7 = vsub.f32 1.0, %v1464_v13  ;;  %v2254_v28 = vpop.eup %2253 }
 0xbf3   :  { %v1451_v9 = vmul.f32 %v2246_v62, %v1450_v53  ;;  %v1487_v29 = vadd.f32 1.0, %v2254_v28 }
 0xbf4   :  { %v1466_v20 = vmul.f32 %v2248_v2, %v1465_v7 }
 0xbf5   :  { %v1452_v58 = vadd.f32 %v2246_v62, %v1451_v9  ;;  %2255 = vrcp.f32 %v1487_v29  ;;  %v1514_v45 = vand.u32 2147483648, %v1487_v29  ;;  %vm1508_vm0 = vweird.f32 %v1487_v29 }
 0xbf6   :  { %v1467_v27 = vadd.f32 %v2248_v2, %v1466_v20  ;;  %2257 = vpow2.f32 %v2018_v31  ;;  %v1512_v46 = vand.u32 2147483647, %v1487_v29 }
 0xbf7   :  { %v1456_v52 = vsel %vm1455_vm10, %v2246_v62, %v1452_v58  ;;  %v1515_v4 = vor.u32 1.1754944e-38, %v1514_v45 }
 0xbf8   :  { %v1471_v33 = vsel %vm1470_vm11, %v2248_v2, %v1467_v27  ;;  %v1461_v21 = vsel %vm1458_vm12, %v1460_v10, %v1456_v52  ;;  %vm1513_vm1 = vcmp.eq.f32.partialorder %v1512_v46, 8.507059e+37 }
 0xbf9   :  { %v1476_v22 = vsel %vm1473_vm13, %v1475_v15, %v1471_v33  ;;  %v1526_v23 = vmul.f32 %v2250_v32, %v1461_v21  ;;  %v1524_v25 = vmul.f32 %v1520_v11, %v1461_v21 }
 0xbfa   :  { %v1527_v5 = vmul.f32 %v2252_v18, %v1476_v22  ;;  %v1525_v48 = vmul.f32 %v1521_v63, %v1476_v22 }
 0xbfb   :  { %1530 = vrot.lane.b32.xlu1 %v1526_v23, %s2293_s7  ;;  %v2256_v30 = vpop.eup %2255 }
 0xbfc   :  { %1532 = vrot.lane.b32.xlu2 %v1527_v5, %s2293_s7  ;;  %v1504_v16 = vmul.f32 %v2256_v30, %v1487_v29  ;;  %v2258_v37 = vpop.eup %2257  ;;  %vm1509_vm14 = vweird.f32 %v2256_v30 }
 0xbfd   :  { %v1486_v41 = vadd.f32 1.0, %v2258_v37  ;;  %vm1510_vm15 = vmor %vm1508_vm0, %vm1509_vm14 }
 0xbfe   :  { %v1505_v36 = vsub.f32 1.0, %v1504_v16 }
 0xbff   :  { %v1499_v61 = vand.u32 2147483648, %v1486_v41  ;;  %vm1493_vm5 = vweird.f32 %v1486_v41  ;;  %v1497_v62 = vand.u32 2147483647, %v1486_v41 }
 0xc00   :  { %v1506_v40 = vmul.f32 %v2256_v30, %v1505_v36 }
 0xc01   :  { %v1500_v2 = vor.u32 1.1754944e-38, %v1499_v61  ;;  %vm1498_vm9 = vcmp.eq.f32.partialorder %v1497_v62, 8.507059e+37 }
 0xc02   :  { %v1507_v43 = vadd.f32 %v2256_v30, %v1506_v40 }
 0xc04   :  { %v1511_v49 = vsel %vm1510_vm15, %v2256_v30, %v1507_v43 }
 0xc05   :  { %v1516_v17 = vsel %vm1513_vm1, %v1515_v4, %v1511_v49 }
 0xc56   :  { %v1533_v60 = vpop.permute.xlu2 %1532 }
 0xc57   :  { %v2766_v42 = vadd.f32 %v1533_v60, %v1525_v48 }
 0xc59   :  { %2259 = vtanh.f32 %v2766_v42 }
 0xc5a   :  { %2261 = vrcp.f32 %v1486_v41 }
 0xc5f   :  { %v2260_v51 = vpop.eup %2259 }
 0xc60   :  { %v2262_v0 = vpop.eup %2261  ;;  %v1541_v44 = vmul.f32 %v2260_v51, %v1516_v17 }
 0xc61   :  { %v1489_v56 = vmul.f32 %v2262_v0, %v1486_v41  ;;  %vm1494_vm4 = vweird.f32 %v2262_v0 }
 0xc62   :  { %v2771_v55 = vsel %vm1713_vm2, %v2745_v14, %v1541_v44  ;;  %vm1495_vm8 = vmor %vm1493_vm5, %vm1494_vm4  ;;  %v1543_v35 = vpack.c.bf16 %v1541_v44, %v1541_v44  ;;  %v1678_v44 = vrot.slane %v2766_v42, 7  ;;  %v1720_v42 = vld [vmem:[%s2858_s13 + $0x8] sm:$0xff] }
 0xc63   :  { %v1490_v57 = vsub.f32 1.0, %v1489_v56 }
 0xc64   :  { %v1547_v8 = vunpack.c.l.b16 %v1543_v35 }
 0xc65   :  { %v1491_v59 = vmul.f32 %v2262_v0, %v1490_v57 }
 0xc66   :  { %v1549_v20 = vrot.slane %v1547_v8, 5 }
 0xc67   :  { %v1492_v54 = vadd.f32 %v2262_v0, %v1491_v59 }
 0xc69   :  { %v1496_v1 = vsel %vm1495_vm8, %v2262_v0, %v1492_v54  ;;  %vm1716_vm8 = vcmask 1046528  }
 0xc6a   :  { %v1501_v13 = vsel %vm1498_vm9, %v1500_v2, %v1496_v1 }
 0xc6d   :  { %v1531_v24 = vpop.permute.xlu1 %1530 }
 0xc6e   :  { %v2773_v26 = vadd.f32 %v1531_v24, %v1524_v25 }
 0xc70   :  { %2263 = vtanh.f32 %v2773_v26  ;;  %v1677_v4 = vrot.slane %v2773_v26, 7  ;;  %v1719_v26 = vld [vmem:[%s2858_s13] sm:$0xff]  ;;  %s2294_s13 = smov 32  }
 0xc76   :  { %v2264_v14 = vpop.eup %2263 }
 0xc77   :  { %v1540_v53 = vmul.f32 %v2264_v14, %v1501_v13 }
 0xc79   :  { %v1542_v7 = vpack.c.bf16 %v1540_v53, %v1540_v53  ;;  %v2778_v12 = vsel %vm1713_vm2, %v2752_v34, %v1540_v53 }
 0xc7b   :  { %v1546_v9 = vunpack.c.l.b16 %v1542_v7 }
 0xc7d   :  { %v1548_v19 = vrot.slane %v1546_v9, 6 }
 0xc7f   :  { %v1550_v39 = vsel %vm610_vm6, %v1549_v20, %v1548_v19 }
 0xc80   :  { %v1551_v58 = vpack.c.b16 %v1550_v39, %v1550_v39 }
 0xc82   :  { %1552 = vrot.lane.b32.xlu0 %v1551_v58, %s2293_s7 }
 0xcf4   :  { %v1553_v27 = vpop.permute.xlu0 %1552 }
 0xcf5   :  { %2020 = vmatmul.msk.bf16.vlgmr.msra.gmra.mxu0 %vm465_vm7, %v1553_v27  ;;  %2021 = vmatmul.msk.bf16.vlgmr.msra.gmra.mxu1 %vm465_vm7, %v1553_v27 }
 0xd72   :  { %v1566_v10 = vpop.f32.mrf.mxu0  ;;  %v1579_v32 = vpop.f32.mrf.mxu1 }
 0xd73   :  { %v1585_v11 = vrot.slane %v1566_v10, 1  ;;  %v1587_v15 = vrot.slane %v1566_v10, 2  ;;  %v1586_v48 = vrot.slane %v1579_v32, 1  ;;  %v1588_v38 = vrot.slane %v1579_v32, 2 }
 0xd75   :  { %v1593_v34 = vadd.f32 %v1585_v11, %v2568_v47  ;;  %v1595_v52 = vadd.f32 %v1587_v15, %v2570_v50  ;;  %v1594_v28 = vadd.f32 %v1586_v48, %v2574_v3  ;;  %v1596_v47 = vadd.f32 %v1588_v38, %v2576_v6 }
 0xd77   :  { %v2022_v18 = vmul.f32 -1.442695, %v1593_v34  ;;  %v2023_v63 = vmul.f32 -1.442695, %v1595_v52  ;;  %v2025_v1 = vmul.f32 -1.442695, %v1596_v47 }
 0xd78   :  { %v2024_v13 = vmul.f32 -1.442695, %v1594_v28 }
 0xd79   :  { %2265 = vpow2.f32 %v2022_v18 }
 0xd7a   :  { %2267 = vpow2.f32 %v2023_v63  ;;  %v1568_v33 = vpop.f32.mrf.mxu0  ;;  %v1581_v21 = vpop.f32.mrf.mxu1 }
 0xd7f   :  { %v2266_v22 = vpop.eup %2265 }
 0xd80   :  { %v2268_v23 = vpop.eup %2267  ;;  %v1603_v25 = vadd.f32 1.0, %v2266_v22 }
 0xd81   :  { %v1604_v5 = vadd.f32 1.0, %v2268_v23 }
 0xd82   :  { %2269 = vrcp.f32 %v1603_v25  ;;  %v1616_v37 = vand.u32 2147483648, %v1603_v25  ;;  %v1614_v60 = vand.u32 2147483647, %v1603_v25  ;;  %vm1610_vm11 = vweird.f32 %v1603_v25 }
 0xd83   :  { %2271 = vrcp.f32 %v1604_v5  ;;  %v1631_v40 = vand.u32 2147483648, %v1604_v5  ;;  %v1629_v45 = vand.u32 2147483647, %v1604_v5  ;;  %vm1625_vm12 = vweird.f32 %v1604_v5 }
 0xd84   :  { %2273 = vtanh.f32 %v1594_v28  ;;  %v1617_v6 = vor.u32 1.1754944e-38, %v1616_v37  ;;  %vm1615_vm0 = vcmp.eq.f32.partialorder %v1614_v60, 8.507059e+37  ;;  %v1856_v60 = vld [vmem:[%s2859_s14] sm:$0xff] }
 0xd85   :  { %2275 = vtanh.f32 %v1596_v47  ;;  %v1632_v51 = vor.u32 1.1754944e-38, %v1631_v40  ;;  %vm1630_vm15 = vcmp.eq.f32.partialorder %v1629_v45, 8.507059e+37 }
 0xd86   :  { %2277 = vpow2.f32 %v2025_v1 }
 0xd88   :  { %v2270_v29 = vpop.eup %2269 }
 0xd89   :  { %v2272_v50 = vpop.eup %2271  ;;  %v1606_v30 = vmul.f32 %v2270_v29, %v1603_v25  ;;  %vm1611_vm6 = vweird.f32 %v2270_v29 }
 0xd8a   :  { %v1621_v31 = vmul.f32 %v2272_v50, %v1604_v5  ;;  %vm1626_vm10 = vweird.f32 %v2272_v50  ;;  %vm1612_vm13 = vmor %vm1610_vm11, %vm1611_vm6  ;;  %v2274_v49 = vpop.eup %2273 }
 0xd8b   :  { %v1607_v16 = vsub.f32 1.0, %v1606_v30  ;;  %vm1627_vm14 = vmor %vm1625_vm12, %vm1626_vm10  ;;  %v2276_v0 = vpop.eup %2275 }
 0xd8c   :  { %v1622_v36 = vsub.f32 1.0, %v1621_v31  ;;  %v2278_v2 = vpop.eup %2277 }
 0xd8d   :  { %v1608_v41 = vmul.f32 %v2270_v29, %v1607_v16  ;;  %v1644_v35 = vadd.f32 1.0, %v2278_v2  ;;  %v2096_v2 = vld [vmem:[%s2861_s9] ss:$0 sm:$0xff] }
 0xd8e   :  { %v1623_v43 = vmul.f32 %v2272_v50, %v1622_v36 }
 0xd8f   :  { %v1609_v46 = vadd.f32 %v2270_v29, %v1608_v41  ;;  %2279 = vrcp.f32 %v1644_v35  ;;  %v1671_v27 = vand.u32 2147483648, %v1644_v35  ;;  %vm1665_vm2 = vweird.f32 %v1644_v35 }
 0xd90   :  { %v1624_v3 = vadd.f32 %v2272_v50, %v1623_v43  ;;  %2281 = vpow2.f32 %v2024_v13  ;;  %v1669_v10 = vand.u32 2147483647, %v1644_v35 }
 0xd91   :  { %v1613_v17 = vsel %vm1612_vm13, %v2270_v29, %v1609_v46  ;;  %v1672_v11 = vor.u32 1.1754944e-38, %v1671_v27 }
 0xd92   :  { %v1628_v56 = vsel %vm1627_vm14, %v2272_v50, %v1624_v3  ;;  %v1618_v57 = vsel %vm1615_vm0, %v1617_v6, %v1613_v17  ;;  %vm1670_vm5 = vcmp.eq.f32.partialorder %v1669_v10, 8.507059e+37  ;;  %v2290_v3 = vld [vmem:[%s2854_s12 + $0x8] sm:$0xff]  ;;  %v2067_v6 = vld [vmem:[%s2860_s8 + $0x18] sm:$0xff] }
 0xd93   :  { %v1633_v59 = vsel %vm1630_vm15, %v1632_v51, %v1628_v56  ;;  %v1683_v24 = vmul.f32 %v2274_v49, %v1618_v57  ;;  %v1681_v54 = vmul.f32 %v1677_v4, %v1618_v57  ;;  %1844 = vmatpush.bf16.msrb.mxu0 %v2067_v6  ;;  %v2066_v49 = vld [vmem:[%s2860_s8 + $0x10] sm:$0xff]  ;;  %v2065_v4 = vld [vmem:[%s2860_s8 + $0x8] sm:$0xff] }
 0xd94   :  { %v1684_v61 = vmul.f32 %v2276_v0, %v1633_v59  ;;  %v1682_v62 = vmul.f32 %v1678_v44, %v1633_v59  ;;  %v2064_v44 = vld [vmem:[%s2860_s8] sm:$0xff]  ;;  %v1857_v56 = vld [vmem:[%s2859_s14 + $0x8] sm:$0xff] }
 0xd95   :  { %1687 = vrot.lane.b32.xlu1 %v1683_v24, %s2293_s7  ;;  %v2280_v14 = vpop.eup %2279 }
 0xd96   :  { %1689 = vrot.lane.b32.xlu2 %v1684_v61, %s2293_s7  ;;  %v1661_v53 = vmul.f32 %v2280_v14, %v1644_v35  ;;  %v2282_v8 = vpop.eup %2281  ;;  %vm1666_vm1 = vweird.f32 %v2280_v14 }
 0xd97   :  { %v1643_v19 = vadd.f32 1.0, %v2282_v8  ;;  %vm1667_vm4 = vmor %vm1665_vm2, %vm1666_vm1  ;;  %1845 = vmatpush.bf16.msrb.mxu0 %v2066_v49 }
 0xd98   :  { %v1662_v7 = vsub.f32 1.0, %v1661_v53 }
 0xd99   :  { %v1656_v48 = vand.u32 2147483648, %v1643_v19  ;;  %vm1650_vm6 = vweird.f32 %v1643_v19  ;;  %v1654_v38 = vand.u32 2147483647, %v1643_v19 }
 0xd9a   :  { %v1663_v9 = vmul.f32 %v2280_v14, %v1662_v7  ;;  %v1870_v7 = vld [vmem:[%s2862_s10] sm:$0xff] }
 0xd9b   :  { %v1657_v29 = vor.u32 1.1754944e-38, %v1656_v48  ;;  %vm1655_vm11 = vcmp.eq.f32.partialorder %v1654_v38, 8.507059e+37  ;;  %1846 = vmatpush.bf16.msrb.mxu0 %v2065_v4 }
 0xd9c   :  { %v1664_v58 = vadd.f32 %v2280_v14, %v1663_v9  ;;  %v1873_v9 = vld [vmem:[%s2863_s11] sm:$0xff] }
 0xd9d   :  { %1723 = vperm.xlu1 %2082, %v1719_v26  }
 0xd9e   :  { %1728 = vperm.xlu2 %2083, %v1720_v42   ;;  %v1668_v32 = vsel %vm1667_vm4, %v2280_v14, %v1664_v58 }
 0xd9f   :  { %v1673_v34 = vsel %vm1670_vm5, %v1672_v11, %v1668_v32  ;;  %1847 = vmatpush.bf16.msrb.mxu0 %v2064_v44 }
 0xda6   :  { %1860 = vperm.xlu2 %2083, %v1856_v60  }
 0xdf0   :  { %v1690_v20 = vpop.permute.xlu2 %1689 }
 0xdf1   :  { %v1694_v39 = vadd.f32 %v1690_v20, %v1682_v62 }
 0xdf3   :  { %2283 = vtanh.f32 %v1694_v39 }
 0xdf4   :  { %2285 = vrcp.f32 %v1643_v19 }
 0xdf8   :  { %v2800_v30 = vpop.permute.xlu2 %1728 }
 0xdf9   :  { %v2284_v15 = vpop.eup %2283 }
 0xdfa   :  { %v2286_v52 = vpop.eup %2285  ;;  %v1698_v18 = vmul.f32 %v2284_v15, %v1673_v34 }
 0xdfb   :  { %v1646_v33 = vmul.f32 %v2286_v52, %v1643_v19  ;;  %vm1651_vm9 = vweird.f32 %v2286_v52 }
 0xdfc   :  { %v1718_v63 = vsel %vm1716_vm8, %v2771_v55, %v1698_v18  ;;  %vm1652_vm10 = vmor %vm1650_vm6, %vm1651_vm9 }
 0xdfd   :  { %v1647_v21 = vsub.f32 1.0, %v1646_v33  ;;  %v1732_v36 = vmul.f32 %v2800_v30, %v1718_v63 }
 0xdff   :  { %v1648_v22 = vmul.f32 %v2286_v52, %v1647_v21 }
 0xe00   :  { %v1861_v53 = vpop.permute.xlu2 %1860 }
 0xe01   :  { %v1649_v5 = vadd.f32 %v2286_v52, %v1648_v22 }
 0xe03   :  { %v1653_v28 = vsel %vm1652_vm10, %v2286_v52, %v1649_v5 }
 0xe04   :  { %v1658_v50 = vsel %vm1655_vm11, %v1657_v29, %v1653_v28 }
 0xe07   :  { %v1688_v23 = vpop.permute.xlu1 %1687 }
 0xe08   :  { %v1693_v25 = vadd.f32 %v1688_v23, %v1681_v54 }
 0xe0a   :  { %2287 = vtanh.f32 %v1693_v25 }
 0xe0f   :  { %v1724_v55 = vpop.permute.xlu1 %1723 }
 0xe10   :  { %v2288_v47 = vpop.eup %2287 }
 0xe11   :  { %v1697_v31 = vmul.f32 %v2288_v47, %v1658_v50 }
 0xe13   :  { %v1717_v16 = vsel %vm1716_vm8, %v2778_v12, %v1697_v31  ;;  %v2289_v12 = vld [vmem:[%s2854_s12] sm:$0xff] }
 0xe14   :  { %v2077_v37 = vpack.i.bf16 %v1718_v63, %v1717_v16  ;;  %v1731_v40 = vmul.f32 %v1724_v55, %v1717_v16 }
 0xe16   :  { %v2084_v41 = vpack.i.bf16 %v1732_v36, %v1731_v40  ;;  %2078 = vrot.lane.b32.xlu0 %v2077_v37, %s2294_s13 }
 0xe1e   :  { %2085 = vrot.lane.b32.xlu0 %v2084_v41, %s2293_s7 }
 0xe26   :  { %1865 = vperm.xlu0 %2094, %v1857_v56  }
 0xe88   :  { %v2079_v43 = vpop.permute.xlu0 %2078 }
 0xe89   :  { %v2081_v45 = vunpack.i.h.bf16 %v2079_v43  ;;  %v2080_v46 = vunpack.i.l.bf16 %v2079_v43 }
 0xe8b   :  { %1752 = vmatpush.msrb.mxu2 %v2080_v46  ;;  %1776 = vmatpush.msrb.mxu3 %v2081_v45 }
 0xe8c   :  { %2026 = vmatmul.msk.f32.vlgmr.msrb.gmra.mxu2 %vm248_vm3, %v2289_v12  ;;  %2027 = vmatmul.msk.f32.vlgmr.msrb.gmra.mxu3 %vm248_vm3, %v2290_v3  ;;  %vm1797_vm3 = vcmask 261120  }
 0xe90   :  { %v2086_v57 = vpop.permute.xlu0 %2085 }
 0xe91   :  { %v2088_v24 = vunpack.i.h.bf16 %v2086_v57  ;;  %v2087_v54 = vunpack.i.l.bf16 %v2086_v57 }
 0xe98   :  { %v1866_v27 = vpop.permute.xlu0 %1865 }
 0xf0f   :  { %v1754_v51 = vpop.f32.mrf.mxu2  ;;  %v1778_v17 = vpop.f32.mrf.mxu3 }
 0xf10   :  { %v2089_v0 = vpack.i.bf16 %v1778_v17, %v1754_v51 }
 0xf12   :  { %2090 = vrot.lane.b32.xlu1 %v2089_v0, %s2294_s13 }
 0xf84   :  { %v2091_v59 = vpop.permute.xlu1 %2090 }
 0xf85   :  { %v2093_v61 = vunpack.i.h.bf16 %v2091_v59  ;;  %v2092_v62 = vunpack.i.l.bf16 %v2091_v59 }
 0xf87   :  { %v1798_v26 = vsel %vm1797_vm3, %v2087_v54, %v2092_v62  ;;  %v1799_v42 = vsel %vm1797_vm3, %v2088_v24, %v2093_v61 }
 0xf88   :  { %v1800_v1 = vpack.c.bf16 %v1799_v42, %v1798_v26 }
 0xf8a   :  { %2044 = vmatmul.msk.bf16.vlgmr.msrb.gmra.mxu0 %vm465_vm7, %v1800_v1 }
0x1007   :  { %v1849_v35 = vpop.f32.mrf.mxu0 }
0x1008   :  { %v1850_v14 = vadd.f32 %v2096_v2, %v1849_v35 }
0x100a   :  { %v1854_v13 = vmul.f32 %v1850_v14, %v1724_v55 }
0x100c   :  { %v1868_v8 = vadd.f32 %v1861_v53, %v1854_v13 }
0x100e   :  { %v1871_v19 = vmul.f32 %v1870_v7, %v1868_v8 }
0x100f   :  { %v1851_v20 = vpop.f32.mrf.mxu0 }
0x1010   :  { %v1852_v39 = vadd.f32 %v2096_v2, %v1851_v20  ;;  %v1874_v58 = vadd.f32 %v1873_v9, %v1871_v19 }
0x1012   :  { %v1855_v10 = vmul.f32 %v1852_v39, %v2800_v30  ;;  %1876 = vst [vmem:[%s2864_s15] sm:$0xff] %v1874_v58 }
0x1014   :  { %v1869_v32 = vadd.f32 %v1866_v27, %v1855_v10 }
0x1016   :  { %v1872_v11 = vmul.f32 %v1870_v7, %v1869_v32 }
0x1018   :  { %v1875_v15 = vadd.f32 %v1873_v9, %v1872_v11 }
0x101a   :  { %1877 = vst [vmem:[%s2864_s15 + $0x8] sm:$0xff] %v1875_v15 }

</bundles_post_ra>
